<compile_context>
chip_gen: v6e
topology: v6e:2x2x1
jax: 0.10.0
libtpu: 0.0.40
codegen_flags: <defaults>
</compile_context>

<pallas_src>
import jax
import jax.numpy as jnp
from jax import lax
from jax.experimental import pallas as pl
from jax.experimental.pallas import tpu as pltpu

EDGE_DIM = 4
EDGE_DIM_PAD = 8

_VMEM = pl.BlockSpec(memory_space=pltpu.MemorySpace.VMEM)


def _round_up(x, m):
    return ((x + m - 1) // m) * m


# ----------------------------- Pallas kernels ------------------------------

def _gat_branch_kernel(x_ref, adj_ref, eat_ref,
                       wlr_ref, blr_ref, we_ref, att_ref, bias_ref,
                       bns_ref, bnh_ref,
                       hout_ref, logit_ref, xr_ref):
    """One grid step = one branch (mean or var): full GATv2+BN+ReLU layer stack."""
    f32, bf16 = jnp.float32, jnp.bfloat16
    npad, cpad = x_ref.shape
    n_layer = wlr_ref.shape[1]

    # dst-row tile: largest divisor of npad whose [ti, npad, cpad] pairwise
    # transient stays under ~8 MiB (bounds live ranges / VMEM pressure).
    budget = 8 * 1024 * 1024
    ti = 8
    for cand in (npad, 512, 256, 128, 64, 32, 16, 8):
        if cand <= npad and npad % cand == 0 and cand * npad * cpad * 4 <= budget:
            ti = cand
            break
    nblk = npad // ti

    adj = adj_ref[...]                               # [NP, NP] f32 0/1 (self loops incl.)
    mask_add = (adj - 1.0) * jnp.float32(1e30)       # 0 on edges, -1e30 elsewhere

    h = x_ref[...]                                   # [NP, CP] f32
    for l in range(n_layer):
        hb = h.astype(bf16)
        # fused Wl|Wr: one MXU dot gives both linear maps
        xlr = jnp.dot(hb, wlr_ref[0, l].astype(bf16),
                      preferred_element_type=f32) + blr_ref[0, l]      # [NP, 2CP]
        xl = xlr[:, :cpad]                           # source-side features (value)
        xr_ref[...] = xlr[:, cpad:]                  # dst-side features (scratch -> pl.ds)
        we = we_ref[0, l].astype(bf16)               # [EDP, CP]
        att3 = att_ref[0, l][None]                   # [1, 1, CP]

        def dst_block(b, carry):
            r0 = b * ti
            e0 = r0 * npad
            if not isinstance(b, int):
                r0 = pl.multiple_of(r0, ti)
                e0 = pl.multiple_of(e0, ti * npad)
            xr_t = xr_ref[pl.ds(r0, ti), :]                              # [ti, CP]
            # edge-attr contribution on the MXU (K=EDP dot), not VPU broadcasts
            ea = jnp.dot(eat_ref[pl.ds(e0, ti * npad), :], we,
                         preferred_element_type=f32)                     # [ti*NP, CP]
            s = xr_t[:, None, :] + xl[None, :, :] + ea.reshape(ti, npad, cpad)
            s = jnp.maximum(s, 0.2 * s)                                  # LeakyReLU(0.2)
            logit_ref[pl.ds(r0, ti), :] = jnp.sum(s * att3, axis=-1)     # [ti, NP]
            return carry

        if nblk == 1:
            dst_block(0, None)
        else:
            lax.fori_loop(0, nblk, dst_block, None, unroll=nblk <= 8)

        # masked softmax over source nodes (incoming edges of each dst row)
        logits = logit_ref[...] + mask_add
        m = jnp.max(logits, axis=1, keepdims=True)
        p = jnp.exp(logits - m) * adj
        denom = jnp.maximum(jnp.sum(p, axis=1, keepdims=True), 1e-20)
        alpha = p * pl.reciprocal(denom, approx=True)                    # EUP reciprocal

        out = jnp.dot(alpha.astype(bf16), xl.astype(bf16),
                      preferred_element_type=f32) + bias_ref[0, l]
        out = out * bns_ref[0, l] + bnh_ref[0, l]                        # folded eval-mode BN
        h = jnp.maximum(out, 0.0)                                        # ReLU
        # TODO(synk): F.dropout(p=0.5) between layers is train-only; identity here.

    hout_ref[...] = h[None]


def _readout_kernel(h_ref, eps_ref, pool_ref, cmask_ref,
                    fc1w_ref, fc1b_ref, fc2w_ref, fc2b_ref, logp_ref):
    """reparameterize + global mean pool + fc1/relu + fc2 + masked log_softmax."""
    f32, bf16 = jnp.float32, jnp.bfloat16
    mean = h_ref[0]                                                    # [NP, CP]
    log_var = h_ref[1]                                                 # [NP, CP]
    z = mean + eps_ref[...] * jnp.exp(0.5 * log_var)                   # reparameterize
    pooled = jnp.dot(pool_ref[...].astype(bf16), z.astype(bf16),
                     preferred_element_type=f32)                       # global_mean_pool
    h1 = jnp.dot(pooled.astype(bf16), fc1w_ref[...].astype(bf16),
                 preferred_element_type=f32) + fc1b_ref[...]
    h1 = jnp.maximum(h1, 0.0)                                          # ReLU
    logits = jnp.dot(h1.astype(bf16), fc2w_ref[...].astype(bf16),
                     preferred_element_type=f32) + fc2b_ref[...]
    valid = cmask_ref[...] > 0.5                                       # [1, NCLSP]
    logits = jnp.where(valid, logits, jnp.float32(-1e30))
    m = jnp.max(logits, axis=1, keepdims=True)
    lse = jnp.log(jnp.sum(jnp.where(valid, jnp.exp(logits - m), 0.0),
                          axis=1, keepdims=True)) + m
    logp_ref[...] = logits - lse                                       # log_softmax


# ----------------------------- pallas_call wrappers -------------------------

def _gat_branches(x_p, adj, eat2d, packed):
    wlr, blr, we, att, bias, bns, bnh = packed
    NP, CP = x_p.shape
    L = wlr.shape[1]
    EDP = we.shape[2]
    small = pl.BlockSpec((1, L, 1, CP), lambda b: (b, 0, 0, 0))
    return pl.pallas_call(
        _gat_branch_kernel,
        out_shape=jax.ShapeDtypeStruct((2, NP, CP), jnp.float32),
        grid=(2,),                                                     # mean / var branch
        in_specs=[
            pl.BlockSpec((NP, CP), lambda b: (0, 0)),                  # x (branch-invariant)
            pl.BlockSpec((NP, NP), lambda b: (0, 0)),                  # adjacency + self loops
            pl.BlockSpec((NP * NP, EDP), lambda b: (0, 0)),            # dense edge attrs (bf16)
            pl.BlockSpec((1, L, CP, 2 * CP), lambda b: (b, 0, 0, 0)),  # Wl|Wr fused
            pl.BlockSpec((1, L, 1, 2 * CP), lambda b: (b, 0, 0, 0)),   # bl|br fused
            pl.BlockSpec((1, L, EDP, CP), lambda b: (b, 0, 0, 0)),     # We
            small,                                                     # att
            small,                                                     # bias
            small,                                                     # bn scale (folded)
            small,                                                     # bn shift (folded)
        ],
        out_specs=pl.BlockSpec((1, NP, CP), lambda b: (b, 0, 0)),
        scratch_shapes=[pltpu.VMEM((NP, NP), jnp.float32),             # attention logits
                        pltpu.VMEM((NP, CP), jnp.float32)],            # dst-side features xr
        compiler_params=pltpu.CompilerParams(
            dimension_semantics=("parallel",),                         # megacore on v7x
            vmem_limit_bytes=32 * 1024 * 1024),
    )(x_p, adj, eat2d, wlr, blr, we, att, bias, bns, bnh)


def _readout(h_out, eps, pool, cmask, fc1w, fc1b, fc2w, fc2b):
    GP = pool.shape[0]
    NCLSP = fc2w.shape[1]
    return pl.pallas_call(
        _readout_kernel,
        out_shape=jax.ShapeDtypeStruct((GP, NCLSP), jnp.float32),
        in_specs=[_VMEM] * 8,
        out_specs=_VMEM,
    )(h_out, eps, pool, cmask, fc1w, fc1b, fc2w, fc2b)


# ----------------------------- plain-JAX glue --------------------------------

def _to_dense(edge_index, edge_attr, npad, edp):
    """Dense adjacency + [N*N, EDP] bf16 edge-attr matrix, mean-filled self loops."""
    src, dst = edge_index[0], edge_index[1]
    d = edge_attr.shape[1]
    sums = jnp.zeros((npad, d), jnp.float32).at[dst].add(edge_attr)
    cnts = jnp.zeros((npad,), jnp.float32).at[dst].add(1.0)
    loop_attr = sums / jnp.maximum(cnts, 1.0)[:, None]                 # fill_value='mean'
    adj = jnp.zeros((npad, npad), jnp.float32).at[dst, src].set(1.0)
    eat = jnp.zeros((npad, npad, edp), jnp.float32).at[dst, src, :d].set(edge_attr)
    diag = jnp.arange(npad)
    adj = adj.at[diag, diag].set(1.0)                                  # add_self_loops
    eat = eat.at[diag, diag, :d].set(loop_attr)
    # TODO(synk): duplicate (src,dst) edges collapse to one adjacency entry here,
    #             unlike PyG's per-edge softmax terms.
    return adj, eat.reshape(npad * npad, edp).astype(jnp.bfloat16)


def _pack_params(params, CP, FCP, NCLSP, EDP):
    """Zero-pad and stack per-layer params as [branch, layer, ...] arrays."""
    L = len(params["mean_convs"])
    agg = params["mean_convs"][0]["wl"].shape[1]

    def z(*shape):
        return jnp.zeros(shape, jnp.float32)

    wlr = z(2, L, CP, 2 * CP)                       # Wl | Wr fused along the out axis
    blr = z(2, L, 1, 2 * CP)
    we = z(2, L, EDP, CP)
    att, bias = z(2, L, 1, CP), z(2, L, 1, CP)
    bns, bnh = z(2, L, 1, CP), z(2, L, 1, CP)
    for b, name in enumerate(("mean_convs", "var_convs")):
        for l, p in enumerate(params[name]):
            fin = p["wl"].shape[0]
            wlr = wlr.at[b, l, :fin, :agg].set(p["wl"])
            wlr = wlr.at[b, l, :fin, CP:CP + agg].set(p["wr"])
            blr = blr.at[b, l, 0, :agg].set(p["bl"])
            blr = blr.at[b, l, 0, CP:CP + agg].set(p["br"])
            we = we.at[b, l, :EDGE_DIM, :agg].set(p["we"])
            att = att.at[b, l, 0, :agg].set(p["att"])
            bias = bias.at[b, l, 0, :agg].set(p["bias"])
            scale = p["bn_gamma"] / jnp.sqrt(p["bn_rv"] + 1e-5)        # eval-mode BN fold
            shift = p["bn_beta"] - p["bn_rm"] * scale
            bns = bns.at[b, l, 0, :agg].set(scale)
            bnh = bnh.at[b, l, 0, :agg].set(shift)

    fc_hidden = params["fc1_w"].shape[1]
    ncls = params["fc2_w"].shape[1]
    fc1w = z(CP, FCP).at[:agg, :fc_hidden].set(params["fc1_w"])
    fc1b = z(1, FCP).at[0, :fc_hidden].set(params["fc1_b"])
    fc2w = z(FCP, NCLSP).at[:fc_hidden, :ncls].set(params["fc2_w"])
    fc2b = z(1, NCLSP).at[0, :ncls].set(params["fc2_b"])
    return (wlr, blr, we, att, bias, bns, bnh), (fc1w, fc1b, fc2w, fc2b)


def init_params(key, n_layer, in_channels, agg_hidden, fc_hidden, num_classes):
    def glorot(k, shape):
        lim = (6.0 / (shape[0] + shape[1])) ** 0.5
        return jax.random.uniform(k, shape, jnp.float32, -lim, lim)

    def conv_params(k, fin, c):
        ks = jax.random.split(k, 4)
        return {
            "wl": glorot(ks[0], (fin, c)), "bl": jnp.zeros((c,), jnp.float32),
            "wr": glorot(ks[1], (fin, c)), "br": jnp.zeros((c,), jnp.float32),
            "we": glorot(ks[2], (EDGE_DIM, c)),
            "att": glorot(ks[3], (1, c))[0],
            "bias": jnp.zeros((c,), jnp.float32),
            "bn_gamma": jnp.ones((c,), jnp.float32),
            "bn_beta": jnp.zeros((c,), jnp.float32),
            "bn_rm": jnp.zeros((c,), jnp.float32),
            "bn_rv": jnp.ones((c,), jnp.float32),
        }

    params = {"mean_convs": [], "var_convs": []}
    fin = in_channels
    for _ in range(n_layer):
        key, km, kv = jax.random.split(key, 3)
        params["mean_convs"].append(conv_params(km, fin, agg_hidden))
        params["var_convs"].append(conv_params(kv, fin, agg_hidden))
        fin = agg_hidden
    key, k1, k2 = jax.random.split(key, 3)
    params["fc1_w"] = glorot(k1, (agg_hidden, fc_hidden))
    params["fc1_b"] = jnp.zeros((fc_hidden,), jnp.float32)
    params["fc2_w"] = glorot(k2, (fc_hidden, num_classes))
    params["fc2_b"] = jnp.zeros((num_classes,), jnp.float32)
    return params


def gaussian_gat_forward(params, x, edge_index, edge_attr, batch, num_graphs, key):
    n, fin = x.shape
    agg = params["mean_convs"][0]["wl"].shape[1]
    fc_hidden = params["fc1_w"].shape[1]
    ncls = params["fc2_w"].shape[1]

    NP = _round_up(n, 8)                         # nodes: sublane-aligned only
    CP = _round_up(max(agg, fin), 128)           # channels (true lane axis)
    FCP = _round_up(fc_hidden, 128)
    NCLSP = _round_up(ncls, 128)
    GP = _round_up(num_graphs, 8)
    EDP = EDGE_DIM_PAD

    x_p = jnp.zeros((NP, CP), jnp.float32).at[:n, :fin].set(x.astype(jnp.float32))
    adj, eat2d = _to_dense(edge_index, edge_attr, NP, EDP)
    packed, fc = _pack_params(params, CP, FCP, NCLSP, EDP)

    # fused GATv2 layer stacks, one branch per (parallel) grid step
    h_out = _gat_branches(x_p, adj, eat2d, packed)                     # [2, NP, CP]

    # reparameterization noise (padded channels masked so they stay inert)
    # TODO(synk): could be generated in-kernel via pltpu.prng_seed/stateful_normal;
    #             negligible at this size so it stays a tiny host-side op.
    eps = jax.random.normal(key, (NP, CP), jnp.float32)
    eps = eps * (jnp.arange(CP) < agg)[None, :].astype(jnp.float32)

    # mean-pool matrix [GP, NP] (padded nodes / graphs contribute nothing)
    batch_p = jnp.full((NP,), GP, jnp.int32).at[:n].set(batch)
    onehot = (batch_p[None, :] == jnp.arange(GP)[:, None]).astype(jnp.float32)
    pool = onehot / jnp.maximum(jnp.sum(onehot, axis=1, keepdims=True), 1.0)

    cmask = (jnp.arange(NCLSP) < ncls).astype(jnp.float32)[None, :]

    fc1w, fc1b, fc2w, fc2b = fc
    logp_p = _readout(h_out, eps, pool, cmask, fc1w, fc1b, fc2w, fc2b)

    logp = logp_p[:num_graphs, :ncls]
    mean = h_out[0, :n, :agg]
    log_var = h_out[1, :n, :agg]
    return logp, mean, log_var


# ----------------------------- main ------------------------------------------

if __name__ == "__main__":
    key = jax.random.PRNGKey(0)
    n_layer, in_channels, agg_hidden, fc_hidden, num_classes = 2, 7, 32, 32, 2

    # two graphs of 8 nodes each (16 nodes total), ring + skip edges, no self loops
    nodes_per_graph, num_graphs = 8, 2
    num_nodes = nodes_per_graph * num_graphs
    src, dst = [], []
    for g in range(num_graphs):
        base = g * nodes_per_graph
        for i in range(nodes_per_graph):
            src += [base + i, base + i]
            dst += [base + (i + 1) % nodes_per_graph, base + (i + 2) % nodes_per_graph]
    edge_index = jnp.array([src, dst], dtype=jnp.int32)                 # [2, 32]
    batch = jnp.array([0] * nodes_per_graph + [1] * nodes_per_graph, dtype=jnp.int32)

    kx, ke, kp, kz = jax.random.split(key, 4)
    x = jax.random.normal(kx, (num_nodes, in_channels), jnp.float32)    # [16, 7]
    edge_attr = jax.random.normal(ke, (edge_index.shape[1], EDGE_DIM), jnp.float32)

    params = init_params(kp, n_layer, in_channels, agg_hidden, fc_hidden, num_classes)

    logp, mean, log_var = gaussian_gat_forward(
        params, x, edge_index, edge_attr, batch, num_graphs, kz)
    logp, mean, log_var = jax.block_until_ready((logp, mean, log_var))

    assert logp.shape == (num_graphs, num_classes)
    assert mean.shape == (num_nodes, agg_hidden)
    assert log_var.shape == (num_nodes, agg_hidden)
    assert bool(jnp.all(jnp.isfinite(logp)))
    assert bool(jnp.all(jnp.isfinite(mean))) and bool(jnp.all(jnp.isfinite(log_var)))
    # rows of log_softmax should sum (in prob space) to 1
    assert bool(jnp.allclose(jnp.exp(logp).sum(axis=1), 1.0, atol=1e-4))
    print("KERNEL_OK")
</pallas_src>

<mosaic_0001>
module attributes {stable_mosaic.version = 11 : i64} {
  func.func @_gat_branch_kernel(%arg0: i32, %arg1: memref<16x128xf32, #tpu.memory_space<vmem>>, %arg2: memref<16x16xf32, #tpu.memory_space<vmem>>, %arg3: memref<256x8xbf16, #tpu.memory_space<vmem>>, %arg4: memref<1x2x128x256xf32, #tpu.memory_space<vmem>>, %arg5: memref<1x2x1x256xf32, #tpu.memory_space<vmem>>, %arg6: memref<1x2x8x128xf32, #tpu.memory_space<vmem>>, %arg7: memref<1x2x1x128xf32, #tpu.memory_space<vmem>>, %arg8: memref<1x2x1x128xf32, #tpu.memory_space<vmem>>, %arg9: memref<1x2x1x128xf32, #tpu.memory_space<vmem>>, %arg10: memref<1x2x1x128xf32, #tpu.memory_space<vmem>>, %arg11: memref<1x16x128xf32, #tpu.memory_space<vmem>>, %arg12: memref<16x16xf32, #tpu.memory_space<vmem>>, %arg13: memref<16x128xf32, #tpu.memory_space<vmem>>) attributes {dimension_semantics = [#tpu.dimension_semantics<parallel>], iteration_bounds = array<i64: 2>, scalar_prefetch = 0 : i64, scratch_operands = 2 : i64, tpu.core_type = #tpu.core_type<tc>, window_params = [{pipeline_mode = #tpu.pipeline_mode<synchronous>, transform_indices = @transform_0, window_bounds = array<i64: 16, 128>}, {pipeline_mode = #tpu.pipeline_mode<synchronous>, transform_indices = @transform_1, window_bounds = array<i64: 16, 16>}, {pipeline_mode = #tpu.pipeline_mode<synchronous>, transform_indices = @transform_2, window_bounds = array<i64: 256, 8>}, {transform_indices = @transform_3, window_bounds = array<i64: 1, 2, 128, 256>}, {transform_indices = @transform_4, window_bounds = array<i64: 1, 2, 1, 256>}, {transform_indices = @transform_5, window_bounds = array<i64: 1, 2, 8, 128>}, {transform_indices = @transform_6, window_bounds = array<i64: 1, 2, 1, 128>}, {transform_indices = @transform_7, window_bounds = array<i64: 1, 2, 1, 128>}, {transform_indices = @transform_8, window_bounds = array<i64: 1, 2, 1, 128>}, {transform_indices = @transform_9, window_bounds = array<i64: 1, 2, 1, 128>}, {transform_indices = @transform_10, window_bounds = array<i64: 1, 16, 128>}]} {
    %c0 = arith.constant 0 : index
    %c0_0 = arith.constant 0 : index
    %0 = vector.load %arg2[%c0, %c0_0] : memref<16x16xf32, #tpu.memory_space<vmem>>, vector<16x16xf32>
    %cst = arith.constant 1.000000e+00 : f32
    %1 = vector.broadcast %cst : f32 to vector<16x16xf32>
    %2 = arith.subf %0, %1 : vector<16x16xf32>
    %cst_1 = arith.constant 1.000000e+30 : f32
    %3 = vector.broadcast %cst_1 : f32 to vector<16x16xf32>
    %4 = arith.mulf %2, %3 : vector<16x16xf32>
    %c0_2 = arith.constant 0 : index
    %c0_3 = arith.constant 0 : index
    %5 = vector.load %arg1[%c0_2, %c0_3] : memref<16x128xf32, #tpu.memory_space<vmem>>, vector<16x128xf32>
    %6 = arith.truncf %5 : vector<16x128xf32> to vector<16x128xbf16>
    %c0_4 = arith.constant 0 : index
    %c0_5 = arith.constant 0 : index
    %c0_6 = arith.constant 0 : index
    %c0_7 = arith.constant 0 : index
    %7 = vector.load %arg4[%c0_4, %c0_5, %c0_6, %c0_7] : memref<1x2x128x256xf32, #tpu.memory_space<vmem>>, vector<1x1x128x256xf32>
    %8 = vector.shape_cast %7 : vector<1x1x128x256xf32> to vector<128x256xf32>
    %9 = arith.truncf %8 : vector<128x256xf32> to vector<128x256xbf16>
    %cst_8 = arith.constant dense<0.000000e+00> : vector<16x256xf32>
    %10 = tpu.matmul %6, %9, %cst_8 {dimension_numbers = #tpu.dot_dimension_numbers<[1], [0], [0], [1], [0, 0, 1, 1], [], []>} : vector<16x128xbf16>, vector<128x256xbf16>, vector<16x256xf32> -> vector<16x256xf32>
    %c0_9 = arith.constant 0 : index
    %c0_10 = arith.constant 0 : index
    %c0_11 = arith.constant 0 : index
    %c0_12 = arith.constant 0 : index
    %11 = vector.load %arg5[%c0_9, %c0_10, %c0_11, %c0_12] : memref<1x2x1x256xf32, #tpu.memory_space<vmem>>, vector<1x1x1x256xf32>
    %12 = vector.shape_cast %11 : vector<1x1x1x256xf32> to vector<1x256xf32>
    %13 = vector.broadcast %12 : vector<1x256xf32> to vector<16x256xf32>
    %14 = arith.addf %10, %13 : vector<16x256xf32>
    %15 = vector.extract_strided_slice %14 {offsets = [0, 0], sizes = [16, 128], strides = [1, 1]} : vector<16x256xf32> to vector<16x128xf32>
    %16 = vector.extract_strided_slice %14 {offsets = [0, 128], sizes = [16, 128], strides = [1, 1]} : vector<16x256xf32> to vector<16x128xf32>
    %c0_13 = arith.constant 0 : index
    %c0_14 = arith.constant 0 : index
    %17 = vector.load %arg13[%c0_13, %c0_14] : memref<16x128xf32, #tpu.memory_space<vmem>>, vector<16x128xf32>
    tpu.vector_store %arg13[%c0_13, %c0_14], %16 {strides = array<i32>} : memref<16x128xf32, #tpu.memory_space<vmem>>, vector<16x128xf32>,
    %c0_15 = arith.constant 0 : index
    %c0_16 = arith.constant 0 : index
    %c0_17 = arith.constant 0 : index
    %c0_18 = arith.constant 0 : index
    %18 = vector.load %arg6[%c0_15, %c0_16, %c0_17, %c0_18] : memref<1x2x8x128xf32, #tpu.memory_space<vmem>>, vector<1x1x8x128xf32>
    %19 = vector.shape_cast %18 : vector<1x1x8x128xf32> to vector<8x128xf32>
    %20 = arith.truncf %19 : vector<8x128xf32> to vector<8x128xbf16>
    %c0_19 = arith.constant 0 : index
    %c0_20 = arith.constant 0 : index
    %c0_21 = arith.constant 0 : index
    %c0_22 = arith.constant 0 : index
    %21 = vector.load %arg7[%c0_19, %c0_20, %c0_21, %c0_22] : memref<1x2x1x128xf32, #tpu.memory_space<vmem>>, vector<1x1x1x128xf32>
    %22 = vector.shape_cast %21 : vector<1x1x1x128xf32> to vector<1x128xf32>
    %23 = vector.shape_cast %22 : vector<1x128xf32> to vector<1x1x128xf32>
    %c0_23 = arith.constant 0 : index
    %c0_24 = arith.constant 0 : index
    %24 = vector.load %arg13[%c0_23, %c0_24] : memref<16x128xf32, #tpu.memory_space<vmem>>, vector<16x128xf32>
    %c0_25 = arith.constant 0 : index
    %c0_26 = arith.constant 0 : index
    %25 = vector.load %arg3[%c0_25, %c0_26] : memref<256x8xbf16, #tpu.memory_space<vmem>>, vector<256x8xbf16>
    %cst_27 = arith.constant dense<0.000000e+00> : vector<256x128xf32>
    %26 = tpu.matmul %25, %20, %cst_27 {dimension_numbers = #tpu.dot_dimension_numbers<[1], [0], [0], [1], [0, 0, 1, 1], [], []>} : vector<256x8xbf16>, vector<8x128xbf16>, vector<256x128xf32> -> vector<256x128xf32>
    %27 = vector.shape_cast %24 : vector<16x128xf32> to vector<16x1x128xf32>
    %28 = vector.shape_cast %15 : vector<16x128xf32> to vector<1x16x128xf32>
    %29 = vector.broadcast %27 : vector<16x1x128xf32> to vector<16x16x128xf32>
    %30 = vector.broadcast %28 : vector<1x16x128xf32> to vector<16x16x128xf32>
    %31 = arith.addf %29, %30 : vector<16x16x128xf32>
    %32 = vector.shape_cast %26 : vector<256x128xf32> to vector<16x16x128xf32>
    %33 = arith.addf %31, %32 : vector<16x16x128xf32>
    %cst_28 = arith.constant 2.000000e-01 : f32
    %34 = vector.broadcast %cst_28 : f32 to vector<16x16x128xf32>
    %35 = arith.mulf %34, %33 : vector<16x16x128xf32>
    %36 = arith.maximumf %33, %35 : vector<16x16x128xf32>
    %37 = vector.broadcast %23 : vector<1x1x128xf32> to vector<16x16x128xf32>
    %38 = arith.mulf %36, %37 : vector<16x16x128xf32>
    %cst_29 = arith.constant dense<0.000000e+00> : vector<16x16xf32>
    %39 = vector.multi_reduction <add>, %38, %cst_29 [2] : vector<16x16x128xf32> to vector<16x16xf32>
    %c0_30 = arith.constant 0 : index
    %c0_31 = arith.constant 0 : index
    %40 = vector.load %arg12[%c0_30, %c0_31] : memref<16x16xf32, #tpu.memory_space<vmem>>, vector<16x16xf32>
    tpu.vector_store %arg12[%c0_30, %c0_31], %39 {strides = array<i32>} : memref<16x16xf32, #tpu.memory_space<vmem>>, vector<16x16xf32>,
    %c0_32 = arith.constant 0 : index
    %c0_33 = arith.constant 0 : index
    %41 = vector.load %arg12[%c0_32, %c0_33] : memref<16x16xf32, #tpu.memory_space<vmem>>, vector<16x16xf32>
    %42 = arith.addf %41, %4 : vector<16x16xf32>
    %cst_34 = arith.constant dense<0xFF800000> : vector<16xf32>
    %43 = vector.multi_reduction <maximumf>, %42, %cst_34 [1] : vector<16x16xf32> to vector<16xf32>
    %44 = vector.shape_cast %43 : vector<16xf32> to vector<16x1xf32>
    %45 = vector.broadcast %44 : vector<16x1xf32> to vector<16x16xf32>
    %46 = arith.subf %42, %45 : vector<16x16xf32>
    %47 = math.exp %46 : vector<16x16xf32>
    %48 = arith.mulf %47, %0 : vector<16x16xf32>
    %cst_35 = arith.constant dense<0.000000e+00> : vector<16xf32>
    %49 = vector.multi_reduction <add>, %48, %cst_35 [1] : vector<16x16xf32> to vector<16xf32>
    %50 = vector.shape_cast %49 : vector<16xf32> to vector<16x1xf32>
    %cst_36 = arith.constant 9.99999968E-21 : f32
    %51 = vector.broadcast %cst_36 : f32 to vector<16x1xf32>
    %52 = arith.maximumf %50, %51 : vector<16x1xf32>
    %53 = tpu.reciprocal %52 {approx = true} : vector<16x1xf32> -> vector<16x1xf32>
    %54 = vector.broadcast %53 : vector<16x1xf32> to vector<16x16xf32>
    %55 = arith.mulf %48, %54 : vector<16x16xf32>
    %56 = arith.truncf %55 : vector<16x16xf32> to vector<16x16xbf16>
    %57 = arith.truncf %15 : vector<16x128xf32> to vector<16x128xbf16>
    %cst_37 = arith.constant dense<0.000000e+00> : vector<16x128xf32>
    %58 = tpu.matmul %56, %57, %cst_37 {dimension_numbers = #tpu.dot_dimension_numbers<[1], [0], [0], [1], [0, 0, 1, 1], [], []>} : vector<16x16xbf16>, vector<16x128xbf16>, vector<16x128xf32> -> vector<16x128xf32>
    %c0_38 = arith.constant 0 : index
    %c0_39 = arith.constant 0 : index
    %c0_40 = arith.constant 0 : index
    %c0_41 = arith.constant 0 : index
    %59 = vector.load %arg8[%c0_38, %c0_39, %c0_40, %c0_41] : memref<1x2x1x128xf32, #tpu.memory_space<vmem>>, vector<1x1x1x128xf32>
    %60 = vector.shape_cast %59 : vector<1x1x1x128xf32> to vector<1x128xf32>
    %61 = vector.broadcast %60 : vector<1x128xf32> to vector<16x128xf32>
    %62 = arith.addf %58, %61 : vector<16x128xf32>
    %c0_42 = arith.constant 0 : index
    %c0_43 = arith.constant 0 : index
    %c0_44 = arith.constant 0 : index
    %c0_45 = arith.constant 0 : index
    %63 = vector.load %arg9[%c0_42, %c0_43, %c0_44, %c0_45] : memref<1x2x1x128xf32, #tpu.memory_space<vmem>>, vector<1x1x1x128xf32>
    %64 = vector.shape_cast %63 : vector<1x1x1x128xf32> to vector<1x128xf32>
    %65 = vector.broadcast %64 : vector<1x128xf32> to vector<16x128xf32>
    %66 = arith.mulf %62, %65 : vector<16x128xf32>
    %c0_46 = arith.constant 0 : index
    %c0_47 = arith.constant 0 : index
    %c0_48 = arith.constant 0 : index
    %c0_49 = arith.constant 0 : index
    %67 = vector.load %arg10[%c0_46, %c0_47, %c0_48, %c0_49] : memref<1x2x1x128xf32, #tpu.memory_space<vmem>>, vector<1x1x1x128xf32>
    %68 = vector.shape_cast %67 : vector<1x1x1x128xf32> to vector<1x128xf32>
    %69 = vector.broadcast %68 : vector<1x128xf32> to vector<16x128xf32>
    %70 = arith.addf %66, %69 : vector<16x128xf32>
    %cst_50 = arith.constant 0.000000e+00 : f32
    %71 = vector.broadcast %cst_50 : f32 to vector<16x128xf32>
    %72 = arith.maximumf %70, %71 : vector<16x128xf32>
    %73 = arith.truncf %72 : vector<16x128xf32> to vector<16x128xbf16>
    %c0_51 = arith.constant 0 : index
    %c1 = arith.constant 1 : index
    %c0_52 = arith.constant 0 : index
    %c0_53 = arith.constant 0 : index
    %74 = vector.load %arg4[%c0_51, %c1, %c0_52, %c0_53] : memref<1x2x128x256xf32, #tpu.memory_space<vmem>>, vector<1x1x128x256xf32>
    %75 = vector.shape_cast %74 : vector<1x1x128x256xf32> to vector<128x256xf32>
    %76 = arith.truncf %75 : vector<128x256xf32> to vector<128x256xbf16>
    %cst_54 = arith.constant dense<0.000000e+00> : vector<16x256xf32>
    %77 = tpu.matmul %73, %76, %cst_54 {dimension_numbers = #tpu.dot_dimension_numbers<[1], [0], [0], [1], [0, 0, 1, 1], [], []>} : vector<16x128xbf16>, vector<128x256xbf16>, vector<16x256xf32> -> vector<16x256xf32>
    %c0_55 = arith.constant 0 : index
    %c1_56 = arith.constant 1 : index
    %c0_57 = arith.constant 0 : index
    %c0_58 = arith.constant 0 : index
    %78 = vector.load %arg5[%c0_55, %c1_56, %c0_57, %c0_58] : memref<1x2x1x256xf32, #tpu.memory_space<vmem>>, vector<1x1x1x256xf32>
    %79 = vector.shape_cast %78 : vector<1x1x1x256xf32> to vector<1x256xf32>
    %80 = vector.broadcast %79 : vector<1x256xf32> to vector<16x256xf32>
    %81 = arith.addf %77, %80 : vector<16x256xf32>
    %82 = vector.extract_strided_slice %81 {offsets = [0, 0], sizes = [16, 128], strides = [1, 1]} : vector<16x256xf32> to vector<16x128xf32>
    %83 = vector.extract_strided_slice %81 {offsets = [0, 128], sizes = [16, 128], strides = [1, 1]} : vector<16x256xf32> to vector<16x128xf32>
    %c0_59 = arith.constant 0 : index
    %c0_60 = arith.constant 0 : index
    %84 = vector.load %arg13[%c0_59, %c0_60] : memref<16x128xf32, #tpu.memory_space<vmem>>, vector<16x128xf32>
    tpu.vector_store %arg13[%c0_59, %c0_60], %83 {strides = array<i32>} : memref<16x128xf32, #tpu.memory_space<vmem>>, vector<16x128xf32>,
    %c0_61 = arith.constant 0 : index
    %c1_62 = arith.constant 1 : index
    %c0_63 = arith.constant 0 : index
    %c0_64 = arith.constant 0 : index
    %85 = vector.load %arg6[%c0_61, %c1_62, %c0_63, %c0_64] : memref<1x2x8x128xf32, #tpu.memory_space<vmem>>, vector<1x1x8x128xf32>
    %86 = vector.shape_cast %85 : vector<1x1x8x128xf32> to vector<8x128xf32>
    %87 = arith.truncf %86 : vector<8x128xf32> to vector<8x128xbf16>
    %c0_65 = arith.constant 0 : index
    %c1_66 = arith.constant 1 : index
    %c0_67 = arith.constant 0 : index
    %c0_68 = arith.constant 0 : index
    %88 = vector.load %arg7[%c0_65, %c1_66, %c0_67, %c0_68] : memref<1x2x1x128xf32, #tpu.memory_space<vmem>>, vector<1x1x1x128xf32>
    %89 = vector.shape_cast %88 : vector<1x1x1x128xf32> to vector<1x128xf32>
    %90 = vector.shape_cast %89 : vector<1x128xf32> to vector<1x1x128xf32>
    %c0_69 = arith.constant 0 : index
    %c0_70 = arith.constant 0 : index
    %91 = vector.load %arg13[%c0_69, %c0_70] : memref<16x128xf32, #tpu.memory_space<vmem>>, vector<16x128xf32>
    %c0_71 = arith.constant 0 : index
    %c0_72 = arith.constant 0 : index
    %92 = vector.load %arg3[%c0_71, %c0_72] : memref<256x8xbf16, #tpu.memory_space<vmem>>, vector<256x8xbf16>
    %cst_73 = arith.constant dense<0.000000e+00> : vector<256x128xf32>
    %93 = tpu.matmul %92, %87, %cst_73 {dimension_numbers = #tpu.dot_dimension_numbers<[1], [0], [0], [1], [0, 0, 1, 1], [], []>} : vector<256x8xbf16>, vector<8x128xbf16>, vector<256x128xf32> -> vector<256x128xf32>
    %94 = vector.shape_cast %91 : vector<16x128xf32> to vector<16x1x128xf32>
    %95 = vector.shape_cast %82 : vector<16x128xf32> to vector<1x16x128xf32>
    %96 = vector.broadcast %94 : vector<16x1x128xf32> to vector<16x16x128xf32>
    %97 = vector.broadcast %95 : vector<1x16x128xf32> to vector<16x16x128xf32>
    %98 = arith.addf %96, %97 : vector<16x16x128xf32>
    %99 = vector.shape_cast %93 : vector<256x128xf32> to vector<16x16x128xf32>
    %100 = arith.addf %98, %99 : vector<16x16x128xf32>
    %cst_74 = arith.constant 2.000000e-01 : f32
    %101 = vector.broadcast %cst_74 : f32 to vector<16x16x128xf32>
    %102 = arith.mulf %101, %100 : vector<16x16x128xf32>
    %103 = arith.maximumf %100, %102 : vector<16x16x128xf32>
    %104 = vector.broadcast %90 : vector<1x1x128xf32> to vector<16x16x128xf32>
    %105 = arith.mulf %103, %104 : vector<16x16x128xf32>
    %cst_75 = arith.constant dense<0.000000e+00> : vector<16x16xf32>
    %106 = vector.multi_reduction <add>, %105, %cst_75 [2] : vector<16x16x128xf32> to vector<16x16xf32>
    %c0_76 = arith.constant 0 : index
    %c0_77 = arith.constant 0 : index
    %107 = vector.load %arg12[%c0_76, %c0_77] : memref<16x16xf32, #tpu.memory_space<vmem>>, vector<16x16xf32>
    tpu.vector_store %arg12[%c0_76, %c0_77], %106 {strides = array<i32>} : memref<16x16xf32, #tpu.memory_space<vmem>>, vector<16x16xf32>,
    %c0_78 = arith.constant 0 : index
    %c0_79 = arith.constant 0 : index
    %108 = vector.load %arg12[%c0_78, %c0_79] : memref<16x16xf32, #tpu.memory_space<vmem>>, vector<16x16xf32>
    %109 = arith.addf %108, %4 : vector<16x16xf32>
    %cst_80 = arith.constant dense<0xFF800000> : vector<16xf32>
    %110 = vector.multi_reduction <maximumf>, %109, %cst_80 [1] : vector<16x16xf32> to vector<16xf32>
    %111 = vector.shape_cast %110 : vector<16xf32> to vector<16x1xf32>
    %112 = vector.broadcast %111 : vector<16x1xf32> to vector<16x16xf32>
    %113 = arith.subf %109, %112 : vector<16x16xf32>
    %114 = math.exp %113 : vector<16x16xf32>
    %115 = arith.mulf %114, %0 : vector<16x16xf32>
    %cst_81 = arith.constant dense<0.000000e+00> : vector<16xf32>
    %116 = vector.multi_reduction <add>, %115, %cst_81 [1] : vector<16x16xf32> to vector<16xf32>
    %117 = vector.shape_cast %116 : vector<16xf32> to vector<16x1xf32>
    %cst_82 = arith.constant 9.99999968E-21 : f32
    %118 = vector.broadcast %cst_82 : f32 to vector<16x1xf32>
    %119 = arith.maximumf %117, %118 : vector<16x1xf32>
    %120 = tpu.reciprocal %119 {approx = true} : vector<16x1xf32> -> vector<16x1xf32>
    %121 = vector.broadcast %120 : vector<16x1xf32> to vector<16x16xf32>
    %122 = arith.mulf %115, %121 : vector<16x16xf32>
    %123 = arith.truncf %122 : vector<16x16xf32> to vector<16x16xbf16>
    %124 = arith.truncf %82 : vector<16x128xf32> to vector<16x128xbf16>
    %cst_83 = arith.constant dense<0.000000e+00> : vector<16x128xf32>
    %125 = tpu.matmul %123, %124, %cst_83 {dimension_numbers = #tpu.dot_dimension_numbers<[1], [0], [0], [1], [0, 0, 1, 1], [], []>} : vector<16x16xbf16>, vector<16x128xbf16>, vector<16x128xf32> -> vector<16x128xf32>
    %c0_84 = arith.constant 0 : index
    %c1_85 = arith.constant 1 : index
    %c0_86 = arith.constant 0 : index
    %c0_87 = arith.constant 0 : index
    %126 = vector.load %arg8[%c0_84, %c1_85, %c0_86, %c0_87] : memref<1x2x1x128xf32, #tpu.memory_space<vmem>>, vector<1x1x1x128xf32>
    %127 = vector.shape_cast %126 : vector<1x1x1x128xf32> to vector<1x128xf32>
    %128 = vector.broadcast %127 : vector<1x128xf32> to vector<16x128xf32>
    %129 = arith.addf %125, %128 : vector<16x128xf32>
    %c0_88 = arith.constant 0 : index
    %c1_89 = arith.constant 1 : index
    %c0_90 = arith.constant 0 : index
    %c0_91 = arith.constant 0 : index
    %130 = vector.load %arg9[%c0_88, %c1_89, %c0_90, %c0_91] : memref<1x2x1x128xf32, #tpu.memory_space<vmem>>, vector<1x1x1x128xf32>
    %131 = vector.shape_cast %130 : vector<1x1x1x128xf32> to vector<1x128xf32>
    %132 = vector.broadcast %131 : vector<1x128xf32> to vector<16x128xf32>
    %133 = arith.mulf %129, %132 : vector<16x128xf32>
    %c0_92 = arith.constant 0 : index
    %c1_93 = arith.constant 1 : index
    %c0_94 = arith.constant 0 : index
    %c0_95 = arith.constant 0 : index
    %134 = vector.load %arg10[%c0_92, %c1_93, %c0_94, %c0_95] : memref<1x2x1x128xf32, #tpu.memory_space<vmem>>, vector<1x1x1x128xf32>
    %135 = vector.shape_cast %134 : vector<1x1x1x128xf32> to vector<1x128xf32>
    %136 = vector.broadcast %135 : vector<1x128xf32> to vector<16x128xf32>
    %137 = arith.addf %133, %136 : vector<16x128xf32>
    %cst_96 = arith.constant 0.000000e+00 : f32
    %138 = vector.broadcast %cst_96 : f32 to vector<16x128xf32>
    %139 = arith.maximumf %137, %138 : vector<16x128xf32>
    %140 = vector.shape_cast %139 : vector<16x128xf32> to vector<1x16x128xf32>
    %c0_97 = arith.constant 0 : index
    %c0_98 = arith.constant 0 : index
    %c0_99 = arith.constant 0 : index
    %141 = vector.load %arg11[%c0_97, %c0_98, %c0_99] : memref<1x16x128xf32, #tpu.memory_space<vmem>>, vector<1x16x128xf32>
    tpu.vector_store %arg11[%c0_97, %c0_98, %c0_99], %140 {strides = array<i32>} : memref<1x16x128xf32, #tpu.memory_space<vmem>>, vector<1x16x128xf32>,
    return
  }
  func.func @transform_0(%arg0: i32) -> (i32, i32) {
    %c0_i32 = arith.constant 0 : i32
    %c0_i32_0 = arith.constant 0 : i32
    %c0_i32_1 = arith.constant 0 : i32
    return %c0_i32, %c0_i32_0 : i32, i32
  }
  func.func @transform_1(%arg0: i32) -> (i32, i32) {
    %c0_i32 = arith.constant 0 : i32
    %c0_i32_0 = arith.constant 0 : i32
    %c0_i32_1 = arith.constant 0 : i32
    return %c0_i32, %c0_i32_0 : i32, i32
  }
  func.func @transform_2(%arg0: i32) -> (i32, i32) {
    %c0_i32 = arith.constant 0 : i32
    %c0_i32_0 = arith.constant 0 : i32
    %c0_i32_1 = arith.constant 0 : i32
    return %c0_i32, %c0_i32_0 : i32, i32
  }
  func.func @transform_3(%arg0: i32) -> (i32, i32, i32, i32) {
    %c0_i32 = arith.constant 0 : i32
    %c0_i32_0 = arith.constant 0 : i32
    %c0_i32_1 = arith.constant 0 : i32
    %c0_i32_2 = arith.constant 0 : i32
    return %arg0, %c0_i32, %c0_i32_0, %c0_i32_1 : i32, i32, i32, i32
  }
  func.func @transform_4(%arg0: i32) -> (i32, i32, i32, i32) {
    %c0_i32 = arith.constant 0 : i32
    %c0_i32_0 = arith.constant 0 : i32
    %c0_i32_1 = arith.constant 0 : i32
    %c0_i32_2 = arith.constant 0 : i32
    return %arg0, %c0_i32, %c0_i32_0, %c0_i32_1 : i32, i32, i32, i32
  }
  func.func @transform_5(%arg0: i32) -> (i32, i32, i32, i32) {
    %c0_i32 = arith.constant 0 : i32
    %c0_i32_0 = arith.constant 0 : i32
    %c0_i32_1 = arith.constant 0 : i32
    %c0_i32_2 = arith.constant 0 : i32
    return %arg0, %c0_i32, %c0_i32_0, %c0_i32_1 : i32, i32, i32, i32
  }
  func.func @transform_6(%arg0: i32) -> (i32, i32, i32, i32) {
    %c0_i32 = arith.constant 0 : i32
    %c0_i32_0 = arith.constant 0 : i32
    %c0_i32_1 = arith.constant 0 : i32
    %c0_i32_2 = arith.constant 0 : i32
    return %arg0, %c0_i32, %c0_i32_0, %c0_i32_1 : i32, i32, i32, i32
  }
  func.func @transform_7(%arg0: i32) -> (i32, i32, i32, i32) {
    %c0_i32 = arith.constant 0 : i32
    %c0_i32_0 = arith.constant 0 : i32
    %c0_i32_1 = arith.constant 0 : i32
    %c0_i32_2 = arith.constant 0 : i32
    return %arg0, %c0_i32, %c0_i32_0, %c0_i32_1 : i32, i32, i32, i32
  }
  func.func @transform_8(%arg0: i32) -> (i32, i32, i32, i32) {
    %c0_i32 = arith.constant 0 : i32
    %c0_i32_0 = arith.constant 0 : i32
    %c0_i32_1 = arith.constant 0 : i32
    %c0_i32_2 = arith.constant 0 : i32
    return %arg0, %c0_i32, %c0_i32_0, %c0_i32_1 : i32, i32, i32, i32
  }
  func.func @transform_9(%arg0: i32) -> (i32, i32, i32, i32) {
    %c0_i32 = arith.constant 0 : i32
    %c0_i32_0 = arith.constant 0 : i32
    %c0_i32_1 = arith.constant 0 : i32
    %c0_i32_2 = arith.constant 0 : i32
    return %arg0, %c0_i32, %c0_i32_0, %c0_i32_1 : i32, i32, i32, i32
  }
  func.func @transform_10(%arg0: i32) -> (i32, i32, i32) {
    %c0_i32 = arith.constant 0 : i32
    %c0_i32_0 = arith.constant 0 : i32
    %c0_i32_1 = arith.constant 0 : i32
    return %arg0, %c0_i32, %c0_i32_0 : i32, i32, i32
  }
}

</mosaic_0001>

<bundles_post_ra>
// kernel: tpu_custom_call.1
= control target key start
LH: loop header
LB: loop body
LE: loop exit
PB: predicated region body
PF: predicated region fallthrough
CT: control target
= control target key end

     0   :  { %15 = vsyncpa [#allocation5], 0  ;;  %s4615_s0 = inlined_call_operand.vmem [shape: f32[16,128], index: 0, kind: input, shape index: {}]   ;;  %s4616_s1 = inlined_call_operand.vmem [shape: f32[16,16], index: 1, kind: input, shape index: {}]   ;;  %s4617_s2 = inlined_call_operand.vmem [shape: bf16[256,8], index: 2, kind: input, shape index: {}]   ;;  %s4618_s3 = inlined_call_operand.hbm [shape: f32[2,2,128,256], index: 3, kind: input, shape index: {}]   ;;  %s4619_s4 = inlined_call_operand.vmem [shape: f32[2,2,1,256], index: 4, kind: input, shape index: {}]   ;;  %s4620_s5 = inlined_call_operand.vmem [shape: f32[2,2,8,128], index: 5, kind: input, shape index: {}]   ;;  %s4621_s6 = inlined_call_operand.vmem [shape: f32[2,2,1,128], index: 6, kind: input, shape index: {}]   ;;  %s4622_s7 = inlined_call_operand.vmem [shape: f32[2,2,1,128], index: 7, kind: input, shape index: {}]   ;;  %s4623_s8 = inlined_call_operand.vmem [shape: f32[2,2,1,128], index: 8, kind: input, shape index: {}]   ;;  %s4624_s9 = inlined_call_operand.vmem [shape: f32[2,2,1,128], index: 9, kind: input, shape index: {}]   ;;  %s4625_s10 = inlined_call_operand.hbm [shape: f32[2,16,128], index: 10, kind: output, shape index: {}]  }
   0x1   :  { %17 = vsyncpa [#allocation5 + $0x1], 0 }
   0x2   :  { %18 = vsyncpa [#allocation6], 0 }
   0x3   :  { %20 = vsyncpa [#allocation6 + $0x1], 0  ;;  %s3482_s13 = smov 0   ;;  %s3484_s14 = smov 0  }
   0x4   :  { %s3486_s15 = smov 0   ;;  %s3488_s16 = smov 0  }
   0x5 LB: > { %4640 = sst [smem:[#allocation10_spill]] %s3411_s15  ;;  %s3503_s17 = sadd.s32 4294967295, %s3415_s16   ;;  %s3415_s16 = sphi %s3488_s16, %s4666_s16   ;;  %s3411_s15 = sphi %s3486_s15, %s4668_s15   ;;  %s3407_s14 = sphi %s3484_s14, %s4670_s14   ;;  %s3403_s13 = sphi %s3482_s13, %s4669_s13  }
   0x6   : > { %s2958_s18 = sadd.s32 4294967294, %s3415_s16   ;;  %s3507_s19 = sadd.s32 1, %s3415_s16  }
   0x7   : > { %4641 = sst [smem:[#allocation11_spill]] %s3507_s19  ;;  %s96_s20 = sadd.s32 1, %s3411_s15 }
   0x8   : > { %s93_s21 = ssub.s32 %s3415_s16, %s3507_s19  ;;  %p103_p0 = scmp.ne.s32.totalorder %s3411_s15, %s3407_s14 }
   0x9   : > { %p94_p1 = scmp.eq.s32.totalorder %s93_s21, 0  ;;  %p104_p2 = scmp.eq.s32.totalorder %s3415_s16, 0 }
   0xa   : > { %p109_p3 = scmp.ne.s32.totalorder %s3407_s14, %s3403_s13  ;;  %p110_p4 = scmp.eq.s32.totalorder %s3503_s17, 0 }
   0xb   : > { %s3519_s22 = scalar_select %p94_p1, %s3411_s15, %s96_s20  }
   0xc   : > { %p3521_p5 = por %p104_p2, %p103_p0  ;;  %p3525_p6 = por %p110_p4, %p109_p3 }
   0xd   : > { %4642 = sst [smem:[#allocation12_spill]] %s3519_s22  ;;  %p289_p7 = scmp.eq.s32.totalorder %s3503_s17, 1 }
   0xe   : > { %s4644_s24 = scalar_select %p3525_p6, 1, 0 }
   0xf   : > { %p295_p8 = scmp.eq.s32.totalorder %s2958_s18, 1  ;;  %p3231_p10 = scmp.lt.s32.totalorder %s3415_s16, 2 }
  0x10   : > { %p3532_p11 = por %p289_p7, %p103_p0  ;;  %s324_s27 = sand.u32 1, %s3411_s15  }
  0x11   : > { %p3536_p12 = por %p295_p8, %p109_p3  ;;  %s3093_s28 = sshll.u32 %s3415_s16, 13 }
  0x12   : > { %s4645_s25 = scalar_select %p3532_p11, 1, 0 }
  0x13   : > { %s4646_s26 = scalar_select %p3536_p12, 1, 0 }
  0x14   : > { %s2961_s29 = sshll.u32 %s324_s27, 9  ;;  %s3545_s12 = scalar_lea.hbm %s4618_s3, %s3093_s28 }
  0x15   : > { %s328_s18 = scalar_lea.vmem [#allocation4], %s2961_s29  ;;  %p3549_p13 = pnand %p3231_p10, %p3521_p5 }
  0x16   : > { %s335_s20 = sshll.u32 %s328_s18, 4  ;;  %s3555_s22 = scalar_lea.sflag [#allocation5], %s324_s27  ;;  %s3553_s20 = int_to_ptr.vmem [resolvable:$true] %s335_s20 }
  0x17   : > { %s3323_s15 = scalar_lea.hbm %s3545_s12, 8192  ;;  %p3325_p1 = pneg %p3549_p13 }
  0x18   : > { %p3324_p0 = scmp.ne.s32.totalorder %s3545_s12, %s3323_s15  ;;  %s3328_s29 = scalar_lea.hbm %s4618_s3, 16384 }
  0x19   : > { %p3329_p4 = scmp.lt.s32.totalorder %s3545_s12, %s4618_s3  ;;  %p3330_p5 = scmp.lt.s32.totalorder %s3328_s29, %s3323_s15 }
  0x1a   : > { %p3326_p2 = pnand %p3325_p1, %p3324_p0 }
  0x1b   : > { %p3331_p7 = por %p3330_p5, %p3329_p4 }
  0x1c   : > { %p3327_p3 = pneg %p3326_p2 }
  0x1e   : > { %p3332_p8 = pnand %p3331_p7, %p3327_p3 }
  0x20   : > { %3335 = shalt.err (!%p3332_p8)
}
  0x21   : > { %s3336_s27 = scalar_lea.vmem %s3553_s20, 8192  ;;  %s3417_s18 = smov [#allocation4]  }
  0x22   : > { %p3337_p10 = scmp.ne.s32.totalorder %s3553_s20, %s3336_s27  ;;  %s3341_s19 = sshll.u32 %s3417_s18, 4  ;;  %s3342_s19 = int_to_ptr.vmem [resolvable:$false] %s3341_s19 }
  0x23   : > { %s3343_s28 = scalar_lea.vmem %s3342_s19, 16384  ;;  %p3344_p2 = scmp.lt.s32.totalorder %s3553_s20, %s3342_s19 }
  0x24   : > { %p3339_p9 = pnand %p3337_p10, %p3325_p1  ;;  %p3345_p12 = scmp.lt.s32.totalorder %s3343_s28, %s3336_s27 }
  0x26   : > { %p3340_p0 = pneg %p3339_p9  ;;  %p3346_p11 = por %p3345_p12, %p3344_p2 }
  0x28   : > { %p3347_p6 = pnand %p3346_p11, %p3340_p0 }
  0x2a   : > { %3350 = shalt.err (!%p3347_p6)
}
  0x2b   : > { %s3418_s15 = smov 256   ;;  %s3419_s30 = smov 16  }
  0x2c   : > { %3226 = dma.hbm_to_vmem [thread:$0]  (!%p3549_p13), %s3545_s12, 8192, %s3553_s20, %s3555_s22, %s3418_s15, %s3418_s15, %s3419_s30  }
  0x2d   : > { %p2964_p9 = scmp.ge.s32.totalorder %s3415_s16, 1  ;;  %p386_p1 = scmp.lt.s32.totalorder %s3415_s16, 3 }
  0x2f   : > { %p387_p3 = pnand %p2964_p9, %p386_p1 }
  0x31   : > { %390 = sbr.rel (%p387_p3) target bundleno = 2021 (0x7e5), region = 60 }
  0x36   : > { %s3579_s19 = sand.u32 1, %s3407_s14   ;;  %p4648_p6 = scmp.ne.s32.totalorder %s4644_s24, 0 }
  0x37   : > { %s2965_s29 = sshll.u32 %s3579_s19, 9  ;;  %s393_s23 = scalar_lea.sflag [#allocation5], %s3579_s19 }
  0x38   : > { %s3583_s11 = scalar_lea.vmem [#allocation4], %s2965_s29 }
  0x39   : > { %3394 = dma.done.wait (%p4648_p6), %s393_s23, 8192  }
  0x3a   : > { %3396 = vsyncadd (%p4648_p6), %s393_s23, 4294959104  ;;  %p458_p11 = scmp.lt.s32.totalorder %s3503_s17, 1  ;;  %v3420_v0 = vmov 0   ;;  %v522_v1 = vld [vmem:[%s3583_s11 + $0xe8] sm:$0xff]  ;;  %v524_v2 = vld [vmem:[%s3583_s11 + $0xf8] sm:$0xff]  ;;  %vm764_vm0 = vcmask 1043456  }
  0x3b   : > { %585 = vmatprep.mubr.bf16.mxu0 %v3420_v0  ;;  %v540_v4 = vpack.c.bf16 %v524_v2, %v522_v1  ;;  %v521_v6 = vld [vmem:[%s3583_s11 + $0xe0] sm:$0xff]  ;;  %v523_v7 = vld [vmem:[%s3583_s11 + $0xf0] sm:$0xff]  ;;  %vm715_vm1 = vcmask 64512   ;;  %v518_v11 = vld [vmem:[%s3583_s11 + $0xc8] sm:$0xff]  ;;  %vm1382_vm2 = vcmask 130112   ;;  %vm1519_vm3 = vcmask 1041409  }
  0x3c   : > { %s3592_s22 = scalar_select %p458_p11, %s3503_s17, 1  ;;  %v539_v8 = vpack.c.bf16 %v523_v7, %v521_v6  ;;  %v3273_v10 = vld [vmem:[%s4617_s2] sm:$0xff]   ;;  %v520_v12 = vld [vmem:[%s3583_s11 + $0xd8] sm:$0xff]  ;;  %v517_v15 = vld [vmem:[%s3583_s11 + $0xc0] sm:$0xff]  ;;  %vm1521_vm4 = vcmask 1042434   ;;  %vm1523_vm5 = vcmask 1043459  }
  0x3d   : > { %553 = vmatprep.subr.bf16.mxu0 %v540_v4  ;;  %3136 = vmatprep.mubr.msk.bf16.mxu1 %vm715_vm1, %v3273_v10  ;;  %v538_v13 = vpack.c.bf16 %v520_v12, %v518_v11  ;;  %v3274_v14 = vld [vmem:[%s4617_s2 + $0x8] sm:$0xff]   ;;  %v519_v16 = vld [vmem:[%s3583_s11 + $0xd0] sm:$0xff]  ;;  %v514_v18 = vld [vmem:[%s3583_s11 + $0xa8] sm:$0xff]  ;;  %vm1525_vm6 = vcmask 1044484   ;;  %vm1527_vm7 = vcmask 1045509   ;;  %vm1529_vm8 = vcmask 1046534  }
  0x3e   : > { %s3094_s12 = sshll.u32 %s3592_s22, 4  ;;  %554 = vmatpush1.bf16.msra.mxu0 %v539_v8  ;;  %v537_v17 = vpack.c.bf16 %v519_v16, %v517_v15  ;;  %v516_v19 = vld [vmem:[%s3583_s11 + $0xb8] sm:$0xff]  ;;  %v513_v20 = vld [vmem:[%s3583_s11 + $0xa0] sm:$0xff]  ;;  %v515_v22 = vld [vmem:[%s3583_s11 + $0xb0] sm:$0xff]  ;;  %v543_v8 = vlaneseq  ;;  %s2967_s23 = sshll.u32 %s3592_s22, 2  ;;  %vm1531_vm9 = vcmask 1047559  }
  0x3f   : > { %s3598_s24 = scalar_lea.vmem %s4620_s5, %s3094_s12  ;;  %555 = vmatprep.subr.bf16.mxu0 %v538_v13  ;;  %v536_v21 = vpack.c.bf16 %v516_v19, %v514_v18  ;;  %v3275_v23 = vld [vmem:[%s4617_s2 + $0x10] sm:$0xff]   ;;  %v510_v24 = vld [vmem:[%s3583_s11 + $0x88] sm:$0xff]  ;;  %v512_v25 = vld [vmem:[%s3583_s11 + $0x98] sm:$0xff]  ;;  %v535_v26 = vpack.c.bf16 %v515_v22, %v513_v20  ;;  %s3743_s21 = scalar_lea.vmem %s4619_s4, %s2967_s23  ;;  %vm1542_vm10 = vcmask 130048   ;;  %vm3423_vm11 = vmmov 0  }
  0x40   : > { %v598_v3 = vld [vmem:[%s3598_s24] sm:$0xff]  ;;  %v534_v27 = vpack.c.bf16 %v512_v25, %v510_v24  ;;  %v509_v28 = vld [vmem:[%s3583_s11 + $0x80] sm:$0xff]  ;;  %v3276_v30 = vld [vmem:[%s4617_s2 + $0x18] sm:$0xff]   ;;  %v3707_v10 = vshrl.u32 %v543_v8, 7  ;;  %v1372_v11 = vand.u32 127, %v543_v8  ;;  %s3095_s23 = sshll.u32 %s3503_s17, 8 }
  0x41   : > { %v599_v5 = vpack.c.bf16 %v598_v3, %v598_v3  ;;  %v511_v29 = vld [vmem:[%s3583_s11 + $0x90] sm:$0xff]  ;;  %v506_v31 = vld [vmem:[%s3583_s11 + $0x68] sm:$0xff]  ;;  %v508_v32 = vld [vmem:[%s3583_s11 + $0x78] sm:$0xff]  ;;  %p4663_p13 = scmp.ne.s32.totalorder %s4645_s25, 0  ;;  %s3424_s17 = smov [#allocation7]  }
  0x42   : > { %556 = vmatpush1.bf16.msra.mxu0 %v537_v17  ;;  %v3277_v33 = vld [vmem:[%s4617_s2 + $0x20] sm:$0xff]   ;;  %v533_v34 = vpack.c.bf16 %v511_v29, %v509_v28  ;;  %v532_v35 = vpack.c.bf16 %v508_v32, %v506_v31  ;;  %v505_v36 = vld [vmem:[%s3583_s11 + $0x60] sm:$0xff]  ;;  %v502_v38 = vld [vmem:[%s3583_s11 + $0x48] sm:$0xff]  ;;  %v3710_v12 = vsub.s32 %v1372_v11, %v3707_v10  ;;  %v1377_v13 = vadd.s32 4294967288, %v1372_v11 }
  0x43   : > { %3216 = vmatprep.subr.msk.bf16.mxu1 %vm764_vm0, %v599_v5  ;;  %v766_v9 = vsel %vm764_vm0, %v599_v5, 0  ;;  %557 = vmatprep.subr.bf16.mxu0 %v536_v21  ;;  %v507_v37 = vld [vmem:[%s3583_s11 + $0x70] sm:$0xff]  ;;  %v504_v39 = vld [vmem:[%s3583_s11 + $0x58] sm:$0xff]  ;;  %v501_v41 = vld [vmem:[%s3583_s11 + $0x40] sm:$0xff]  ;;  %v4631_v29 = vsub.s32 1, %v3707_v10 }
  0x44   : > { %3135 = vmatpush3.bf16.msra.mxu1 %v766_v9  ;;  %v531_v40 = vpack.c.bf16 %v507_v37, %v505_v36  ;;  %v530_v42 = vpack.c.bf16 %v504_v39, %v502_v38  ;;  %v503_v43 = vld [vmem:[%s3583_s11 + $0x50] sm:$0xff]  ;;  %v3278_v44 = vld [vmem:[%s4617_s2 + $0x28] sm:$0xff]   ;;  %v498_v45 = vld [vmem:[%s3583_s11 + $0x28] sm:$0xff]  ;;  %v4632_v9 = vmov 0.0   ;;  %4649 = vst [vmem:[#allocation13_spill] sm:$0xff] %v3710_v12 }
  0x45   : > { %v500_v46 = vld [vmem:[%s3583_s11 + $0x38] sm:$0xff]  ;;  %v497_v47 = vld [vmem:[%s3583_s11 + $0x20] sm:$0xff]  ;;  %v529_v49 = vpack.c.bf16 %v503_v43, %v501_v41  ;;  %v499_v50 = vld [vmem:[%s3583_s11 + $0x30] sm:$0xff] }
  0x46   : > { %558 = vmatpush1.bf16.msra.mxu0 %v535_v26  ;;  %v3279_v48 = vld [vmem:[%s4617_s2 + $0x30] sm:$0xff]   ;;  %v528_v51 = vpack.c.bf16 %v500_v46, %v498_v45  ;;  %v494_v52 = vld [vmem:[%s3583_s11 + $0x8] sm:$0xff]  ;;  %v496_v53 = vld [vmem:[%s3583_s11 + $0x18] sm:$0xff]  ;;  %v527_v54 = vpack.c.bf16 %v499_v50, %v497_v47  ;;  %v3422_v26 = vmov 1966171168  }
  0x47   : > { %3137 = vmatmul.mubr.msk.bf16.vlgmr.msra.gmra.mxu1 %vm715_vm1, %v3274_v14  ;;  %559 = vmatprep.subr.bf16.mxu0 %v534_v27  ;;  %v3280_v55 = vld [vmem:[%s4617_s2 + $0x38] sm:$0xff]   ;;  %v493_v56 = vld [vmem:[%s3583_s11] sm:$0xff]  ;;  %v526_v57 = vpack.c.bf16 %v496_v53, %v494_v52  ;;  %v495_v58 = vld [vmem:[%s3583_s11 + $0x10] sm:$0xff]  ;;  %v3713_v14 = vsub.s32 %v1377_v13, %v3707_v10  ;;  %v933_v27 = vunpack.c.l.s4 %v3422_v26 }
  0x48   : > { %3140 = vmatprep.mubr.msk.bf16.mxu1 %vm715_vm1, %v3275_v23  ;;  %v490_v59 = vld [vmem:[%s4615_s0] sm:$0xff]  ;;  %v491_v60 = vld [vmem:[%s4615_s0 + $0x8] sm:$0xff]  ;;  %v525_v62 = vpack.c.bf16 %v495_v58, %v493_v56  ;;  %v3283_v2 = vld [vmem:[%s4617_s2 + $0x50] sm:$0xff]  }
  0x49   : > { %v3281_v61 = vld [vmem:[%s4617_s2 + $0x40] sm:$0xff]   ;;  %v492_v63 = vpack.c.bf16 %v491_v60, %v490_v59  ;;  %v3282_v1 = vld [vmem:[%s4617_s2 + $0x48] sm:$0xff]   ;;  %v3284_v3 = vld [vmem:[%s4617_s2 + $0x58] sm:$0xff]   ;;  %4650 = vst [vmem:[#allocation14_spill] sm:$0xff] %v3713_v14  ;;  %v934_v31 = vunpack.c.0.s8 %v933_v27 }
  0x4a   : > { %560 = vmatpush1.bf16.msra.mxu0 %v533_v34  ;;  %v3285_v4 = vld [vmem:[%s4617_s2 + $0x60] sm:$0xff]   ;;  %v3286_v5 = vld [vmem:[%s4617_s2 + $0x68] sm:$0xff]   ;;  %v3287_v6 = vld [vmem:[%s4617_s2 + $0x70] sm:$0xff]  }
  0x4b   : > { %561 = vmatprep.subr.bf16.mxu0 %v532_v35  ;;  %v3288_v7 = vld [vmem:[%s4617_s2 + $0x78] sm:$0xff]   ;;  %v541_v32 = vld [vmem:[%s3743_s21] sm:$0x3]  ;;  %v3757_v37 = vsub.s32 %v934_v31, %v3707_v10  ;;  %v3046_v43 = vld [vmem:[%s3598_s24 + $0x8] sm:$0xff]  ;;  %s3790_s24 = sshll.u32 %s3592_s22, 1  ;;  %s2966_s22 = sshll.u32 %s3579_s19, 4 }
  0x4c   : > { %v550_v35 = vrot.slane %v541_v32, %v4631_v29  ;;  %v3770_v50 = vpack.c.bf16 %v3046_v43, %v3046_v43  ;;  %s3801_s28 = scalar_lea.vmem %s4621_s6, %s3790_s24  ;;  %s4198_s20 = scalar_lea.vmem %s4622_s7, %s3790_s24 }
  0x4d   : > { %v3813_v27 = vld [vmem:[%s3801_s28] ss:$0 sm:$0xff]  ;;  %s4204_s18 = scalar_lea.vmem %s4623_s8, %s3790_s24  ;;  %s4212_s30 = scalar_lea.vmem %s4624_s9, %s3790_s24 }
  0x4e   : > { %562 = vmatpush1.bf16.msra.mxu0 %v531_v40  ;;  %s457_s15 = scalar_lea.vmem [#allocation7], %s2966_s22  ;;  %s2800_s24 = scalar_lea.sflag [#allocation6], %s3579_s19 }
  0x4f   : > { %3141 = vmatmul.mubr.msk.bf16.gmra.mxu1 %vm715_vm1, %v3276_v30  ;;  %563 = vmatprep.subr.bf16.mxu0 %v530_v42  ;;  %s2813_s29 = sshll.u32 %s457_s15, 4  ;;  %s4567_s29 = int_to_ptr.vmem [resolvable:$true] %s2813_s29 }
  0x50   : > { %3144 = vmatprep.mubr.msk.bf16.mxu1 %vm715_vm1, %v3277_v33  ;;  %v3750_v33 = vsub.s32 0, %v3707_v10  ;;  %s3351_s12 = scalar_lea.vmem %s4567_s29, 256 }
  0x51   : > { %p3352_p12 = scmp.ne.s32.totalorder %s4567_s29, %s3351_s12 }
  0x52   : > { %564 = vmatpush1.bf16.msra.mxu0 %v529_v49  ;;  %v546_v39 = vrot.slane %v541_v32, %v3750_v33 }
  0x53   : > { %565 = vmatprep.subr.bf16.mxu0 %v528_v51  ;;  %p3353_p4 = pnand %p3352_p12, %p4663_p13 }
  0x55   : > { %p3354_p5 = pneg %p3353_p4 }
  0x56   : > { %566 = vmatpush1.bf16.msra.mxu0 %v527_v54 }
  0x57   : > { %3145 = vmatmul.mubr.msk.bf16.gmra.mxu1 %vm715_vm1, %v3278_v44  ;;  %567 = vmatprep.subr.bf16.mxu0 %v526_v57 }
  0x58   : > { %3148 = vmatprep.mubr.msk.bf16.mxu1 %vm715_vm1, %v3279_v48 }
  0x5a   : > { %568 = vmatpush1.bf16.msra.mxu0 %v525_v62 }
  0x5b   : > { %3168 = vmatprep.subr.bf16.mxu0 %v4632_v9 }
  0x5d   : > { %586 = vmatmul.mubr.bf16.vlgmr.msra.gmra.mxu0 %v492_v63 }
  0x5f   : > { %3149 = vmatmul.mubr.msk.bf16.gmra.mxu1 %vm715_vm1, %v3280_v55 }
  0x60   : > { %3152 = vmatprep.mubr.msk.bf16.mxu1 %vm715_vm1, %v3281_v61 }
  0x67   : > { %3153 = vmatmul.mubr.msk.bf16.gmra.mxu1 %vm715_vm1, %v3282_v1 }
  0x68   : > { %3156 = vmatprep.mubr.msk.bf16.mxu1 %vm715_vm1, %v3283_v2 }
  0x6f   : > { %3157 = vmatmul.mubr.msk.bf16.gmra.mxu1 %vm715_vm1, %v3284_v3 }
  0x70   : > { %3160 = vmatprep.mubr.msk.bf16.mxu1 %vm715_vm1, %v3285_v4 }
  0x77   : > { %3161 = vmatmul.mubr.msk.bf16.gmra.mxu1 %vm715_vm1, %v3286_v5 }
  0x78   : > { %3164 = vmatprep.mubr.msk.bf16.mxu1 %vm715_vm1, %v3287_v6 }
  0x7f   : > { %3165 = vmatmul.mubr.msk.bf16.gmra.mxu1 %vm715_vm1, %v3288_v7 }
  0x80   : > { %1743 = vmatprep.mubr.bf16.mxu1 %v3420_v0 }
 0x107   : > { %v3715_v15 = vpop.f32.mrf.mxu1 }
 0x109   : > { %v802_v16 = vpop.f32.mrf.mxu1 }
 0x10b   : > { %v3717_v17 = vpop.f32.mrf.mxu1 }
 0x10d   : > { %v3719_v0 = vpop.f32.mrf.mxu1 }
 0x10f   : > { %v3721_v18 = vpop.f32.mrf.mxu1 }
 0x111   : > { %v3723_v19 = vpop.f32.mrf.mxu1 }
 0x113   : > { %v3725_v20 = vpop.f32.mrf.mxu1 }
 0x115   : > { %v3727_v21 = vpop.f32.mrf.mxu1 }
 0x117   : > { %v3729_v22 = vpop.f32.mrf.mxu1 }
 0x119   : > { %v3731_v23 = vpop.f32.mrf.mxu1 }
 0x11b   : > { %v3733_v24 = vpop.f32.mrf.mxu1 }
 0x11d   : > { %v3736_v25 = vpop.f32.mrf.mxu1  ;;  %v587_v36 = vpop.f32.mrf.mxu0 }
 0x11e   : > { %v3768_v48 = vadd.f32 %v587_v36, %v546_v39 }
 0x11f   : > { %v3738_v28 = vpop.f32.mrf.mxu1  ;;  %v589_v40 = vpop.f32.mrf.mxu0 }
 0x120   : > { %v590_v41 = vadd.f32 %v589_v40, %v550_v35 }
 0x121   : > { %v3746_v30 = vpop.f32.mrf.mxu1  ;;  %v591_v44 = vpop.f32.mrf.mxu0 }
 0x122   : > { %v938_v45 = vrot.slane %v590_v41, %v3757_v37  ;;  %v3766_v46 = vadd.f32 %v591_v44, %v546_v39  ;;  %v931_v3 = vcombine.high %v590_v41, %v590_v41 }
 0x123   : > { %v3752_v34 = vpop.f32.mrf.mxu1  ;;  %v593_v49 = vpop.f32.mrf.mxu0 }
 0x124   : > { %v954_v51 = vrot.slane %v938_v45, %v3757_v37  ;;  %v1576_v53 = vpack.c.bf16 %v3766_v46, %v3768_v48  ;;  %v594_v54 = vadd.f32 %v593_v49, %v550_v35  ;;  %v946_v56 = vcombine.high %v938_v45, %v938_v45 }
 0x125   : > { %v3759_v38 = vpop.f32.mrf.mxu1 }
 0x126   : > { %v1032_v57 = vrot.slane %v954_v51, %v3750_v33  ;;  %3169 = vmatpush3.bf16.msra.mxu0 %v1576_v53  ;;  %v980_v59 = vcombine.high %v594_v54, %v594_v54  ;;  %v3786_v62 = vrot.slane %v946_v56, %v3757_v37  ;;  %v987_v63 = vrot.slane %v594_v54, %v3757_v37 }
 0x127   : > { %v3762_v42 = vpop.f32.mrf.mxu1  ;;  %3217 = vmatprep.subr.msk.bf16.mxu0 %vm764_vm0, %v3770_v50  ;;  %v976_v35 = vcombine.high %v954_v51, %v954_v51 }
 0x128   : > { %v1109_v61 = vadd.f32 %v1032_v57, %v3768_v48  ;;  %v994_v4 = vrot.slane %v980_v59, %v3757_v37  ;;  %v3804_v7 = vrot.slane %v987_v63, %v3757_v37  ;;  %v1036_v8 = vrot.slane %v3786_v62, %v3750_v33 }
 0x129   : > { %v866_v47 = vpop.f32.mrf.mxu1  ;;  %v1110_v13 = vadd.f32 %v1032_v57, %v3766_v46  ;;  %v1040_v51 = vrot.slane %v976_v35, %v3750_v33  ;;  %v995_v54 = vcombine.high %v987_v63, %v987_v63 }
 0x12a   : > { %v1141_v2 = vadd.f32 %v1109_v61, %v802_v16  ;;  %v945_v16 = vrot.slane %v931_v3, %v3757_v37  ;;  %v996_v31 = vcombine.high %v994_v4, %v994_v4  ;;  %v1064_v36 = vrot.slane %v3804_v7, %v3750_v33 }
 0x12b   : > { %v3773_v52 = vpop.f32.mrf.mxu1  ;;  %v1111_v39 = vadd.f32 %v1036_v8, %v3768_v48  ;;  %v1142_v41 = vadd.f32 %v1110_v13, %v3719_v0 }
 0x12c   : > { %v1173_v6 = vmul.f32 0.2, %v1141_v2  ;;  %v947_v43 = vcombine.high %v945_v16, %v945_v16  ;;  %v3825_v45 = vrot.slane %v945_v16, %v3757_v37  ;;  %v3828_v49 = vrot.slane %v996_v31, %v3757_v37 }
 0x12d   : > { %v869_v55 = vpop.f32.mrf.mxu1  ;;  %v1125_v56 = vadd.f32 %v1064_v36, %v3768_v48  ;;  %v1143_v57 = vadd.f32 %v3715_v15, %v1111_v39  ;;  %v1126_v0 = vadd.f32 %v1064_v36, %v3766_v46  ;;  %v1174_v59 = vmul.f32 0.2, %v1142_v41 }
 0x12e   : > { %v1205_v26 = vmax.f32 %v1141_v2, %v1173_v6  ;;  %v3837_v61 = vrot.slane %v947_v43, %v3757_v37  ;;  %v3840_v2 = vrot.slane %v994_v4, %v3757_v37  ;;  %v1048_v13 = vrot.slane %v3825_v45, %v3750_v33 }
 0x12f   : > { %v3778_v58 = vpop.f32.mrf.mxu1  ;;  %v1175_v3 = vmul.f32 0.2, %v1143_v57  ;;  %v1206_v63 = vmax.f32 %v1142_v41, %v1174_v59  ;;  %v1112_v16 = vadd.f32 %v1036_v8, %v3766_v46  ;;  %v1028_v15 = vcombine.high %v3828_v49, %v3828_v49 }
 0x130   : > { %v1243_v44 = vmul.f32 %v3813_v27, %v1205_v26  ;;  %v3847_v26 = vadd.f32 %v1125_v56, %v866_v47  ;;  %v3850_v31 = vrot.slane %v995_v54, %v3757_v37  ;;  %v1113_v4 = vadd.f32 %v1040_v51, %v3768_v48 }
 0x131   : > { %v3782_v60 = vpop.f32.mrf.mxu1  ;;  %v1207_v35 = vmax.f32 %v1143_v57, %v1175_v3  ;;  %v977_v36 = vcombine.high %v3825_v45, %v3825_v45  ;;  %v3855_v39 = vadd.f32 %v1126_v0, %v869_v55  ;;  %v1244_v41 = vmul.f32 %v3813_v27, %v1206_v63 }
 0x132   : > { %1275 = vadd.xlane.f32.xlu0 %v1243_v44  ;;  %v1144_v8 = vadd.f32 %v3717_v17, %v1112_v16  ;;  %v1092_v47 = vrot.slane %v1028_v15, %v3750_v33  ;;  %v1145_v44 = vadd.f32 %v1113_v4, %v3723_v19  ;;  %v1026_v56 = vcombine.high %v3840_v2, %v3840_v2 }
 0x133   : > { %v3792_v1 = vpop.f32.mrf.mxu1  ;;  %v1245_v43 = vmul.f32 %v3813_v27, %v1207_v35  ;;  %v978_v57 = vcombine.high %v3786_v62, %v3786_v62  ;;  %v1025_v55 = vcombine.high %v3804_v7, %v3804_v7  ;;  %v1114_v17 = vadd.f32 %v1040_v51, %v3766_v46 }
 0x134   : > { %v1176_v45 = vmul.f32 0.2, %v1144_v8  ;;  %v1189_v0 = vmul.f32 0.2, %v3847_v26  ;;  %v3872_v59 = vrot.slane %v3850_v31, %v3750_v33  ;;  %v1177_v19 = vmul.f32 0.2, %v1145_v44 }
 0x135   : > { %v3795_v5 = vpop.f32.mrf.mxu1  ;;  %1279 = vadd.xlane.f32.xlu1 %v1245_v43  ;;  %v1117_v3 = vadd.f32 %v1048_v13, %v3768_v48  ;;  %v3876_v63 = vmul.f32 0.2, %v3855_v39  ;;  %v1146_v7 = vadd.f32 %v1114_v17, %v3727_v21  ;;  %v1118_v16 = vadd.f32 %v1048_v13, %v3766_v46 }
 0x136   : > { %1277 = vadd.xlane.f32.xlu0 %v1244_v41  ;;  %v1208_v62 = vmax.f32 %v1144_v8, %v1176_v45  ;;  %v1139_v51 = vadd.f32 %v1092_v47, %v3768_v48  ;;  %v1209_v15 = vmax.f32 %v1145_v44, %v1177_v19  ;;  %v1088_v35 = vrot.slane %v1026_v56, %v3750_v33 }
 0x137   : > { %v3808_v11 = vpop.f32.mrf.mxu1  ;;  %v1149_v41 = vadd.f32 %v1117_v3, %v3731_v23  ;;  %v979_v43 = vcombine.high %v3837_v61, %v3837_v61  ;;  %v1178_v45 = vmul.f32 0.2, %v1146_v7  ;;  %v1072_v21 = vrot.slane %v1025_v55, %v3750_v33 }
 0x138   : > { %v1246_v8 = vmul.f32 %v3813_v27, %v1208_v62  ;;  %v1247_v44 = vmul.f32 %v3813_v27, %v1209_v15  ;;  %v1127_v56 = vadd.f32 %v3872_v59, %v3768_v48  ;;  %v1140_v19 = vadd.f32 %v1092_v47, %v3766_v46 }
 0x139   : > { %v3815_v32 = vpop.f32.mrf.mxu1  ;;  %v1181_v17 = vmul.f32 0.2, %v1149_v41  ;;  %v1210_v23 = vmax.f32 %v1146_v7, %v1178_v45  ;;  %v1150_v3 = vadd.f32 %v1118_v16, %v3736_v25  ;;  %v1221_v9 = vmax.f32 %v3847_v26, %v1189_v0 }
 0x13a   : > { %1281 = vadd.xlane.f32.xlu1 %v1246_v8  ;;  %v1222_v62 = vmax.f32 %v3855_v39, %v3876_v63  ;;  %1283 = vadd.xlane.f32.xlu0 %v1247_v44  ;;  %v1138_v7 = vadd.f32 %v1088_v35, %v3766_v46  ;;  %v1044_v26 = vrot.slane %v978_v57, %v3750_v33 }
 0x13b   : > { %v3820_v40 = vpop.f32.mrf.mxu1  ;;  %v1213_v55 = vmax.f32 %v1149_v41, %v1181_v17  ;;  %v1248_v15 = vmul.f32 %v3813_v27, %v1210_v23  ;;  %v1182_v8 = vmul.f32 0.2, %v1150_v3  ;;  %v1052_v39 = vrot.slane %v3837_v61, %v3750_v33 }
 0x13c   : > { %v1116_v41 = vadd.f32 %v1044_v26, %v3766_v46  ;;  %v1259_v17 = vmul.f32 %v3813_v27, %v1221_v9  ;;  %v1128_v9 = vadd.f32 %v3872_v59, %v3766_v46 }
 0x13d   : > { %v3830_v53 = vpop.f32.mrf.mxu1  ;;  %v1251_v25 = vmul.f32 %v3813_v27, %v1213_v55  ;;  %v1214_v16 = vmax.f32 %v1150_v3, %v1182_v8  ;;  %v1119_v45 = vadd.f32 %v1052_v39, %v3768_v48  ;;  %v1120_v44 = vadd.f32 %v1052_v39, %v3766_v46 }
 0x13e   : > { %1285 = vadd.xlane.f32.xlu1 %v1248_v15  ;;  %v1130_v39 = vadd.f32 %v1072_v21, %v3766_v46 }
 0x13f   : > { %v3166_v6 = vpop.f32.mrf.mxu1  ;;  %1291 = vadd.xlane.f32.xlu0 %v1251_v25  ;;  %v1252_v57 = vmul.f32 %v3813_v27, %v1214_v16  ;;  %v1151_v3 = vadd.f32 %v3729_v22, %v1119_v45  ;;  %v1260_v22 = vmul.f32 %v3813_v27, %v1222_v62  ;;  %v1159_v45 = vadd.f32 %v3762_v42, %v1127_v56 }
 0x140   : > { %v3889_v13 = vadd.f32 %v3166_v6, %v1139_v51  ;;  %v1137_v6 = vadd.f32 %v1088_v35, %v3768_v48  ;;  %v1115_v35 = vadd.f32 %v1044_v26, %v3768_v48  ;;  %v4651_v42 = vcombine.high %v3850_v31, %v3850_v31 }
 0x141   : > { %v914_v54 = vpop.f32.mrf.mxu1 }
 0x142   : > { %v3905_v47 = vmul.f32 0.2, %v3889_v13  ;;  %v1169_v0 = vadd.f32 %v1137_v6, %v914_v54  ;;  %v1152_v6 = vadd.f32 %v3733_v24, %v1120_v44  ;;  %1293 = vadd.xlane.f32.xlu1 %v1252_v57  ;;  %v1076_v56 = vrot.slane %v4651_v42, %v3750_v33 }
 0x143   : > { %v3167_v4 = vpop.f32.mrf.mxu1  ;;  %1307 = vadd.xlane.f32.xlu0 %v1259_v17  ;;  %v1191_v17 = vmul.f32 0.2, %v1159_v45 }
 0x144   : > { %v3901_v29 = vadd.f32 %v3167_v4, %v1140_v19  ;;  %v1056_v4 = vrot.slane %v977_v36, %v3750_v33  ;;  %v1147_v19 = vadd.f32 %v3721_v18, %v1115_v35  ;;  %v1148_v36 = vadd.f32 %v3725_v20, %v1116_v41 }
 0x145   : > { %v917_v51 = vpop.f32.mrf.mxu1  ;;  %v1201_v55 = vmul.f32 0.2, %v1169_v0  ;;  %v1183_v18 = vmul.f32 0.2, %v1151_v3  ;;  %v1129_v20 = vadd.f32 %v1072_v21, %v3768_v48  ;;  %v1184_v26 = vmul.f32 0.2, %v1152_v6 }
 0x146   : > { %v1170_v63 = vadd.f32 %v1138_v7, %v917_v51  ;;  %v1121_v54 = vadd.f32 %v1056_v4, %v3768_v48  ;;  %v1122_v23 = vadd.f32 %v1056_v4, %v3766_v46  ;;  %v1204_v51 = vmul.f32 0.2, %v3901_v29  ;;  %1309 = vadd.xlane.f32.xlu1 %v1260_v22 }
 0x147   : > { %v1179_v8 = vmul.f32 0.2, %v1147_v19  ;;  %v1180_v25 = vmul.f32 0.2, %v1148_v36  ;;  %v1235_v16 = vmax.f32 %v3889_v13, %v3905_v47  ;;  %v1233_v35 = vmax.f32 %v1169_v0, %v1201_v55 }
 0x148   : > { %v1202_v15 = vmul.f32 0.2, %v1170_v63  ;;  %v1153_v7 = vadd.f32 %v1121_v54, %v3746_v30  ;;  %v1154_v24 = vadd.f32 %v1122_v23, %v3759_v38  ;;  %v1215_v59 = vmax.f32 %v1151_v3, %v1183_v18 }
 0x149   : > { %v1211_v30 = vmax.f32 %v1147_v19, %v1179_v8  ;;  %v1212_v4 = vmax.f32 %v1148_v36, %v1180_v25  ;;  %v1236_v44 = vmax.f32 %v3901_v29, %v1204_v51  ;;  %v1060_v38 = vrot.slane %v979_v43, %v3750_v33 }
 0x14a   : > { %v1185_v41 = vmul.f32 0.2, %v1153_v7  ;;  %v1234_v57 = vmax.f32 %v1170_v63, %v1202_v15  ;;  %v1160_v21 = vadd.f32 %v3773_v52, %v1128_v9  ;;  %v1216_v47 = vmax.f32 %v1152_v6, %v1184_v26 }
 0x14b   : > { %v1249_v62 = vmul.f32 %v3813_v27, %v1211_v30  ;;  %v1250_v13 = vmul.f32 %v3813_v27, %v1212_v4  ;;  %v1186_v0 = vmul.f32 0.2, %v1154_v24  ;;  %v1161_v29 = vadd.f32 %v1129_v20, %v3782_v60 }
 0x14c   : > { %v1162_v63 = vadd.f32 %v1130_v39, %v3795_v5  ;;  %v1253_v61 = vmul.f32 %v3813_v27, %v1215_v59  ;;  %v1217_v43 = vmax.f32 %v1153_v7, %v1185_v41  ;;  %v3951_v52 = vmul.f32 %v3813_v27, %v1233_v35 }
 0x14d   : > { %1287 = vadd.xlane.f32.xlu0 %v1249_v62  ;;  %1289 = vadd.xlane.f32.xlu1 %v1250_v13  ;;  %v1123_v54 = vadd.f32 %v1060_v38, %v3768_v48  ;;  %v3955_v23 = vmul.f32 %v3813_v27, %v1234_v57  ;;  %v3958_v31 = vmul.f32 %v3813_v27, %v1235_v16  ;;  %v1192_v5 = vmul.f32 0.2, %v1160_v21 }
 0x14e   : > { %v3961_v60 = vmul.f32 %v3813_v27, %v1236_v44  ;;  %v1254_v19 = vmul.f32 %v3813_v27, %v1216_v47  ;;  %v1218_v36 = vmax.f32 %v1154_v24, %v1186_v0  ;;  %v1124_v3 = vadd.f32 %v1060_v38, %v3766_v46 }
 0x14f   : > { %v1131_v6 = vadd.f32 %v1076_v56, %v3768_v48  ;;  %v1132_v55 = vadd.f32 %v1076_v56, %v3766_v46  ;;  %v1084_v51 = vrot.slane %v3828_v49, %v3750_v33  ;;  %v1193_v15 = vmul.f32 0.2, %v1161_v29 }
 0x150   : > { %v1255_v7 = vmul.f32 %v3813_v27, %v1217_v43  ;;  %v1223_v9 = vmax.f32 %v1159_v45, %v1191_v17  ;;  %v1155_v8 = vadd.f32 %v3738_v28, %v1123_v54  ;;  %v1224_v25 = vmax.f32 %v1160_v21, %v1192_v5 }
 0x151   : > { %1295 = vadd.xlane.f32.xlu0 %v1253_v61  ;;  %1297 = vadd.xlane.f32.xlu1 %v1254_v19  ;;  %v1194_v18 = vmul.f32 0.2, %v1162_v63  ;;  %v1256_v20 = vmul.f32 %v3813_v27, %v1218_v36  ;;  %v1156_v22 = vadd.f32 %v3752_v34, %v1124_v3  ;;  %v1135_v26 = vadd.f32 %v1084_v51, %v3768_v48 }
 0x152   : > { %v1163_v24 = vadd.f32 %v3778_v58, %v1131_v6  ;;  %v1225_v49 = vmax.f32 %v1161_v29, %v1193_v15  ;;  %v1261_v39 = vmul.f32 %v3813_v27, %v1223_v9  ;;  %v1187_v16 = vmul.f32 0.2, %v1155_v8 }
 0x153   : > { %v1164_v30 = vadd.f32 %v3792_v1, %v1132_v55  ;;  %v1226_v4 = vmax.f32 %v1162_v63, %v1194_v18  ;;  %v1262_v28 = vmul.f32 %v3813_v27, %v1224_v25  ;;  %v1188_v35 = vmul.f32 0.2, %v1156_v22 }
 0x154   : > { %v1080_v59 = vrot.slane %v3840_v2, %v3750_v33  ;;  %v1136_v34 = vadd.f32 %v1084_v51, %v3766_v46  ;;  %v1195_v41 = vmul.f32 0.2, %v1163_v24  ;;  %v1167_v58 = vadd.f32 %v3808_v11, %v1135_v26 }
 0x155   : > { %1299 = vadd.xlane.f32.xlu0 %v1255_v7  ;;  %1301 = vadd.xlane.f32.xlu1 %v1256_v20  ;;  %v1263_v45 = vmul.f32 %v3813_v27, %v1225_v49  ;;  %v1219_v44 = vmax.f32 %v1155_v8, %v1187_v16  ;;  %v1196_v57 = vmul.f32 0.2, %v1164_v30  ;;  %v1264_v62 = vmul.f32 %v3813_v27, %v1226_v4 }
 0x156   : > { %v1168_v1 = vadd.f32 %v3820_v40, %v1136_v34  ;;  %v1220_v38 = vmax.f32 %v1156_v22, %v1188_v35  ;;  %v1133_v21 = vadd.f32 %v1080_v59, %v3768_v48  ;;  %v1134_v2 = vadd.f32 %v1080_v59, %v3766_v46 }
 0x157   : > { %v1227_v13 = vmax.f32 %v1163_v24, %v1195_v41  ;;  %v1199_v47 = vmul.f32 0.2, %v1167_v58  ;;  %v1257_v11 = vmul.f32 %v3813_v27, %v1219_v44  ;;  %v1228_v42 = vmax.f32 %v1164_v30, %v1196_v57 }
 0x158   : > { %v1165_v0 = vadd.f32 %v1133_v21, %v3815_v32  ;;  %v1200_v56 = vmul.f32 0.2, %v1168_v1  ;;  %v1166_v29 = vadd.f32 %v1134_v2, %v3830_v53  ;;  %v1258_v40 = vmul.f32 %v3813_v27, %v1220_v38 }
 0x159   : > { %1311 = vadd.xlane.f32.xlu0 %v1261_v39  ;;  %1313 = vadd.xlane.f32.xlu1 %v1262_v28  ;;  %v1231_v63 = vmax.f32 %v1167_v58, %v1199_v47  ;;  %v1265_v61 = vmul.f32 %v3813_v27, %v1227_v13  ;;  %v1266_v17 = vmul.f32 %v3813_v27, %v1228_v42 }
 0x15a   : > { %v1197_v48 = vmul.f32 0.2, %v1165_v0  ;;  %v1232_v46 = vmax.f32 %v1168_v1, %v1200_v56  ;;  %v1198_v43 = vmul.f32 0.2, %v1166_v29 }
 0x15b   : > { %v1269_v54 = vmul.f32 %v3813_v27, %v1231_v63 }
 0x15c   : > { %v1229_v32 = vmax.f32 %v1165_v0, %v1197_v48  ;;  %v1230_v5 = vmax.f32 %v1166_v29, %v1198_v43  ;;  %v1270_v53 = vmul.f32 %v3813_v27, %v1232_v46  ;;  %v4036_v43 = vld [vmem:[%s4616_s1] sm:$0xff] }
 0x15d   : > { %1315 = vadd.xlane.f32.xlu0 %v1263_v45  ;;  %1317 = vadd.xlane.f32.xlu1 %v1264_v62 }
 0x15e   : > { %v1267_v19 = vmul.f32 %v3813_v27, %v1229_v32  ;;  %v1268_v36 = vmul.f32 %v3813_v27, %v1230_v5 }
 0x161   : > { %1303 = vadd.xlane.f32.xlu0 %v1257_v11  ;;  %1305 = vadd.xlane.f32.xlu1 %v1258_v40 }
 0x165   : > { %1319 = vadd.xlane.f32.xlu0 %v1265_v61  ;;  %1321 = vadd.xlane.f32.xlu1 %v1266_v17 }
 0x169   : > { %1327 = vadd.xlane.f32.xlu0 %v1269_v54  ;;  %1329 = vadd.xlane.f32.xlu1 %v1270_v53 }
 0x16d   : > { %1323 = vadd.xlane.f32.xlu0 %v1267_v19  ;;  %1325 = vadd.xlane.f32.xlu1 %v1268_v36  ;;  %v2974_v19 = vadd.f32 -1.0, %v4036_v43 }
 0x171   : > { %1331 = vadd.xlane.f32.xlu0 %v3951_v52  ;;  %1333 = vadd.xlane.f32.xlu1 %v3955_v23 }
 0x175   : > { %1335 = vadd.xlane.f32.xlu0 %v3958_v31  ;;  %1337 = vadd.xlane.f32.xlu1 %v3961_v60 }
 0x1bb   : > { %v1276_v3 = vpop.xlane.xlu0 %1275 }
 0x1bc   : > { %v1376_v28 = vrot.slane %v1276_v3, %v3710_v12 }
 0x1be   : > { %v1280_v6 = vpop.xlane.xlu1 %1279 }
 0x1bf   : > { %v1278_v55 = vpop.xlane.xlu0 %1277  ;;  %v1387_v24 = vrot.slane %v1280_v6, %v3710_v12 }
 0x1c0   : > { %v1381_v49 = vrot.slane %v1278_v55, %v3713_v14  ;;  %v4044_v55 = vmul.f32 1e+30, %v2974_v19 }
 0x1c2   : > { %v1383_v41 = vsel %vm1382_vm2, %v1381_v49, %v1376_v28  ;;  %4652 = vst [vmem:[#allocation15_spill] sm:$0xff] %v4044_v55 }
 0x1c3   : > { %v1282_v51 = vpop.xlane.xlu1 %1281  ;;  %v1284_v15 = vpop.xlane.xlu0 %1283 }
 0x1c4   : > { %v1391_v60 = vrot.slane %v1282_v51, %v3713_v14  ;;  %v1396_v30 = vrot.slane %v1284_v15, %v3710_v12 }
 0x1c6   : > { %v1392_v35 = vsel %vm1382_vm2, %v1391_v60, %v1387_v24 }
 0x1c7   : > { %v1286_v7 = vpop.xlane.xlu1 %1285  ;;  %v1520_v57 = vsel %vm1519_vm3, %v1392_v35, %v1383_v41 }
 0x1c8   : > { %v1292_v9 = vpop.xlane.xlu0 %1291  ;;  %v1400_v26 = vrot.slane %v1286_v7, %v3713_v14 }
 0x1c9   : > { %v1414_v13 = vrot.slane %v1292_v9, %v3710_v12 }
 0x1ca   : > { %v1401_v34 = vsel %vm1382_vm2, %v1400_v26, %v1396_v30 }
 0x1cb   : > { %v1294_v8 = vpop.xlane.xlu1 %1293  ;;  %v1522_v21 = vsel %vm1521_vm4, %v1401_v34, %v1520_v57 }
 0x1cc   : > { %v4001_v25 = vpop.xlane.xlu0 %1307  ;;  %v1418_v1 = vrot.slane %v1294_v8, %v3713_v14 }
 0x1ce   : > { %v1419_v56 = vsel %vm1382_vm2, %v1418_v1, %v1414_v13 }
 0x1cf   : > { %v4003_v27 = vpop.xlane.xlu1 %1309 }
 0x1d0   : > { %v1454_v15 = vrot.slane %v4003_v27, %v3713_v14 }
 0x1d6   : > { %v1288_v18 = vpop.xlane.xlu0 %1287  ;;  %v1290_v52 = vpop.xlane.xlu1 %1289 }
 0x1d7   : > { %v1409_v39 = vrot.slane %v1290_v52, %v3713_v14  ;;  %v1405_v59 = vrot.slane %v1288_v18, %v3710_v12  ;;  %v1450_v18 = vrot.slane %v4001_v25, %v3710_v12 }
 0x1d9   : > { %v1410_v58 = vsel %vm1382_vm2, %v1409_v39, %v1405_v59  ;;  %v1455_v49 = vsel %vm1382_vm2, %v1454_v15, %v1450_v18  ;;  %v3042_v15 = vld [vmem:[%s3583_s11 + $0x1e8] sm:$0xff]  ;;  %v3043_v18 = vld [vmem:[%s3583_s11 + $0x1f0] sm:$0xff] }
 0x1da   : > { %v1296_v20 = vpop.xlane.xlu0 %1295  ;;  %v1298_v23 = vpop.xlane.xlu1 %1297  ;;  %v1524_v47 = vsel %vm1523_vm5, %v1410_v58, %v1522_v21 }
 0x1db   : > { %v1427_v45 = vrot.slane %v1298_v23, %v3713_v14  ;;  %v1423_v2 = vrot.slane %v1296_v20, %v3710_v12  ;;  %v1526_v63 = vsel %vm1525_vm6, %v1419_v56, %v1524_v47  ;;  %v485_v47 = vld [vmem:[%s4616_s1 + $0x8] sm:$0xff] }
 0x1dc   : > { %v2975_v56 = vadd.f32 -1.0, %v485_v47 }
 0x1dd   : > { %v1428_v11 = vsel %vm1382_vm2, %v1427_v45, %v1423_v2 }
 0x1de   : > { %v1300_v22 = vpop.xlane.xlu0 %1299  ;;  %v1302_v31 = vpop.xlane.xlu1 %1301  ;;  %v1528_v46 = vsel %vm1527_vm7, %v1428_v11, %v1526_v63 }
 0x1df   : > { %v1436_v62 = vrot.slane %v1302_v31, %v3713_v14  ;;  %v1432_v0 = vrot.slane %v1300_v22, %v3710_v12 }
 0x1e1   : > { %v1437_v29 = vsel %vm1382_vm2, %v1436_v62, %v1432_v0 }
 0x1e2   : > { %v1312_v16 = vpop.xlane.xlu0 %1311  ;;  %v1314_v4 = vpop.xlane.xlu1 %1313  ;;  %v1530_v17 = vsel %vm1529_vm8, %v1437_v29, %v1528_v46  ;;  %v4084_v29 = vmul.f32 1e+30, %v2975_v56 }
 0x1e3   : > { %v1463_v6 = vrot.slane %v1314_v4, %v3713_v14  ;;  %v1459_v7 = vrot.slane %v1312_v16, %v3710_v12 }
 0x1e4   : > { %4653 = vst [vmem:[#allocation16_spill] sm:$0xff] %v4084_v29 }
 0x1e5   : > { %v1464_v22 = vsel %vm1382_vm2, %v1463_v6, %v1459_v7  ;;  %v3044_v7 = vld [vmem:[%s3583_s11 + $0x1f8] sm:$0xff] }
 0x1e6   : > { %v1316_v44 = vpop.xlane.xlu0 %1315  ;;  %v1318_v38 = vpop.xlane.xlu1 %1317  ;;  %v1533_v30 = vsel %vm1519_vm3, %v1464_v22, %v1455_v49 }
 0x1e7   : > { %v1472_v51 = vrot.slane %v1318_v38, %v3713_v14  ;;  %v1468_v52 = vrot.slane %v1316_v44, %v3710_v12 }
 0x1e9   : > { %v1473_v26 = vsel %vm1382_vm2, %v1472_v51, %v1468_v52  ;;  %v4654_v51 = vmov 0.0   ;;  %v3038_v52 = vld [vmem:[%s3583_s11 + $0x1c8] sm:$0xff] }
 0x1ea   : > { %v1304_v42 = vpop.xlane.xlu0 %1303  ;;  %v1306_v40 = vpop.xlane.xlu1 %1305  ;;  %v1534_v35 = vsel %vm1521_vm4, %v1473_v26, %v1533_v30  ;;  %3170 = vmatprep.mubr.msk.bf16.mxu0 %vm3423_vm11, %v4654_v51  ;;  %v3036_v26 = vld [vmem:[%s3583_s11 + $0x1b8] sm:$0xff] }
 0x1eb   : > { %v1441_v48 = vrot.slane %v1304_v42, %v3710_v12  ;;  %v1445_v61 = vrot.slane %v1306_v40, %v3713_v14  ;;  %v3032_v30 = vld [vmem:[%s3583_s11 + $0x198] sm:$0xff] }
 0x1ed   : > { %v1446_v32 = vsel %vm1382_vm2, %v1445_v61, %v1441_v48 }
 0x1ee   : > { %v1320_v54 = vpop.xlane.xlu0 %1319  ;;  %v1532_v5 = vsel %vm1531_vm9, %v1446_v32, %v1530_v17  ;;  %v1322_v53 = vpop.xlane.xlu1 %1321 }
 0x1ef   : > { %1543 = vst.msk [vmem:[#allocation2] sm:$0xff] %vm1542_vm10, %v1532_v5  ;;  %v1481_v9 = vrot.slane %v1322_v53, %v3713_v14  ;;  %v1477_v31 = vrot.slane %v1320_v54, %v3710_v12 }
 0x1f1   : > { %v1482_v25 = vsel %vm1382_vm2, %v1481_v9, %v1477_v31  ;;  %v3041_v9 = vld [vmem:[%s3583_s11 + $0x1e0] sm:$0xff] }
 0x1f2   : > { %v1328_v36 = vpop.xlane.xlu0 %1327  ;;  %v1330_v3 = vpop.xlane.xlu1 %1329  ;;  %v1535_v41 = vsel %vm1523_vm5, %v1482_v25, %v1534_v35  ;;  %v3037_v31 = vld [vmem:[%s3583_s11 + $0x1c0] sm:$0xff] }
 0x1f3   : > { %v1499_v59 = vrot.slane %v1330_v3, %v3713_v14  ;;  %v1495_v45 = vrot.slane %v1328_v36, %v3710_v12  ;;  %v3033_v25 = vld [vmem:[%s3583_s11 + $0x1a0] sm:$0xff] }
 0x1f4   : > { %v3029_v35 = vld [vmem:[%s3583_s11 + $0x180] sm:$0xff] }
 0x1f5   : > { %v1500_v38 = vsel %vm1382_vm2, %v1499_v59, %v1495_v45  ;;  %v3031_v59 = vld [vmem:[%s3583_s11 + $0x190] sm:$0xff] }
 0x1f6   : > { %v1324_v8 = vpop.xlane.xlu0 %1323  ;;  %v1326_v20 = vpop.xlane.xlu1 %1325  ;;  %v1545_v23 = vld [vmem:[#allocation2] sm:$0xff] }
 0x1f7   : > { %v1490_v60 = vrot.slane %v1326_v20, %v3713_v14  ;;  %v1547_v27 = vadd.f32 %v1545_v23, %v4044_v55  ;;  %v1486_v24 = vrot.slane %v1324_v8, %v3710_v12  ;;  %v1697_v8 = vpack.c.bf16 %v3044_v7, %v3042_v15  ;;  %v3040_v20 = vld [vmem:[%s3583_s11 + $0x1d8] sm:$0xff]  ;;  %v3292_v15 = vld [vmem:[%s4617_s2 + $0x18] sm:$0xff]   ;;  %v3293_v7 = vld [vmem:[%s4617_s2 + $0x20] sm:$0xff]  }
 0x1f8   : > { %v1696_v23 = vpack.c.bf16 %v3043_v18, %v3041_v9  ;;  %v1695_v22 = vpack.c.bf16 %v3040_v20, %v3038_v52  ;;  %v3294_v9 = vld [vmem:[%s4617_s2 + $0x28] sm:$0xff]   ;;  %v3296_v18 = vld [vmem:[%s4617_s2 + $0x38] sm:$0xff]  }
 0x1f9   : > { %v1549_v16 = vsel %vm1542_vm10, %v1547_v27, -inf  ;;  %v1491_v4 = vsel %vm1382_vm2, %v1490_v60, %v1486_v24  ;;  %v3039_v60 = vld [vmem:[%s3583_s11 + $0x1d0] sm:$0xff]  ;;  %1711 = vmatprep.subr.bf16.mxu1 %v1697_v8  ;;  %v3295_v8 = vld [vmem:[%s4617_s2 + $0x30] sm:$0xff]   ;;  %v3014_v52 = vld [vmem:[%s3583_s11 + $0x108] sm:$0xff] }
 0x1fa   : > { %v1332_v39 = vpop.xlane.xlu0 %1331  ;;  %v1334_v28 = vpop.xlane.xlu1 %1333  ;;  %1550 = vmax.xlane.f32.xlu0 %v1549_v16  ;;  %v1536_v44 = vsel %vm1525_vm6, %v1491_v4, %v1535_v41  ;;  %1712 = vmatpush1.bf16.msra.mxu1 %v1696_v23  ;;  %v1694_v24 = vpack.c.bf16 %v3039_v60, %v3037_v31  ;;  %v3030_v16 = vld [vmem:[%s3583_s11 + $0x188] sm:$0xff]  ;;  %v3028_v41 = vld [vmem:[%s3583_s11 + $0x178] sm:$0xff]  ;;  %v3013_v23 = vld [vmem:[%s3583_s11 + $0x100] sm:$0xff] }
 0x1fb   : > { %v1508_v34 = vrot.slane %v1334_v28, %v3713_v14  ;;  %v1504_v58 = vrot.slane %v1332_v39, %v3710_v12  ;;  %v1537_v13 = vsel %vm1527_vm7, %v1500_v38, %v1536_v44  ;;  %1713 = vmatprep.subr.bf16.mxu1 %v1695_v22  ;;  %v3035_v39 = vld [vmem:[%s3583_s11 + $0x1b0] sm:$0xff]  ;;  %v1691_v28 = vpack.c.bf16 %v3032_v30, %v3030_v16  ;;  %v3025_v44 = vld [vmem:[%s3583_s11 + $0x160] sm:$0xff]  ;;  %v3024_v38 = vld [vmem:[%s3583_s11 + $0x158] sm:$0xff] }
 0x1fc   : > { %v1692_v4 = vpack.c.bf16 %v3035_v39, %v3033_v25  ;;  %v3016_v20 = vld [vmem:[%s3583_s11 + $0x118] sm:$0xff]  ;;  %v3015_v31 = vld [vmem:[%s3583_s11 + $0x110] sm:$0xff] }
 0x1fd   : > { %v1509_v1 = vsel %vm1382_vm2, %v1508_v34, %v1504_v58  ;;  %v3026_v34 = vld [vmem:[%s3583_s11 + $0x168] sm:$0xff]  ;;  %v1690_v58 = vpack.c.bf16 %v3031_v59, %v3029_v35  ;;  %v1683_v22 = vpack.c.bf16 %v3016_v20, %v3014_v52  ;;  %v3297_v60 = vld [vmem:[%s4617_s2 + $0x40] sm:$0xff]   ;;  %v3302_v39 = vld [vmem:[%s4617_s2 + $0x68] sm:$0xff]  }
 0x1fe   : > { %v1336_v57 = vpop.xlane.xlu0 %1335  ;;  %v1338_v62 = vpop.xlane.xlu1 %1337  ;;  %v1538_v0 = vsel %vm1529_vm8, %v1509_v1, %v1537_v13  ;;  %1714 = vmatpush1.bf16.msra.mxu1 %v1694_v24  ;;  %v1689_v45 = vpack.c.bf16 %v3028_v41, %v3026_v34  ;;  %v3023_v13 = vld [vmem:[%s3583_s11 + $0x150] sm:$0xff]  ;;  %v3299_v24 = vld [vmem:[%s4617_s2 + $0x50] sm:$0xff]  }
 0x1ff   : > { %v1513_v21 = vrot.slane %v1336_v57, %v3710_v12  ;;  %v1517_v2 = vrot.slane %v1338_v62, %v3713_v14  ;;  %v3027_v57 = vld [vmem:[%s3583_s11 + $0x170] sm:$0xff]  ;;  %v3022_v62 = vld [vmem:[%s3583_s11 + $0x148] sm:$0xff] }
 0x200   : > { %v1688_v1 = vpack.c.bf16 %v3027_v57, %v3025_v44  ;;  %v3301_v25 = vld [vmem:[%s4617_s2 + $0x60] sm:$0xff]  }
 0x201   : > { %v1518_v11 = vsel %vm1382_vm2, %v1517_v2, %v1513_v21  ;;  %v1687_v21 = vpack.c.bf16 %v3024_v38, %v3022_v62  ;;  %v3021_v2 = vld [vmem:[%s3583_s11 + $0x140] sm:$0xff]  ;;  %v3011_v30 = vld [vmem:[%s4204_s18] ss:$0 sm:$0xff] }
 0x202   : > { %v1539_v42 = vsel %vm1531_vm9, %v1518_v11, %v1538_v0  ;;  %v3018_v0 = vld [vmem:[%s3583_s11 + $0x128] sm:$0xff]  ;;  %v3020_v11 = vld [vmem:[%s3583_s11 + $0x138] sm:$0xff]  ;;  %v3012_v59 = vld [vmem:[%s4212_s30] ss:$0 sm:$0xff] }
 0x203   : > { %1544 = vst.msk [vmem:[#allocation2 + $0x8] sm:$0xff] %vm1542_vm10, %v1539_v42  ;;  %v3017_v42 = vld [vmem:[%s3583_s11 + $0x120] sm:$0xff]  ;;  %v1685_v56 = vpack.c.bf16 %v3020_v11, %v3018_v0 }
 0x204   : > { %v3303_v38 = vld [vmem:[%s4617_s2 + $0x70] sm:$0xff]  }
 0x20a   : > { %v1546_v40 = vld [vmem:[#allocation2 + $0x8] sm:$0xff] }
 0x20b   : > { %v1548_v63 = vadd.f32 %v1546_v40, %v4084_v29  ;;  %v3019_v40 = vld [vmem:[%s3583_s11 + $0x130] sm:$0xff] }
 0x20d   : > { %v1552_v48 = vsel %vm1542_vm10, %v1548_v63, -inf }
 0x20e   : > { %1553 = vmax.xlane.f32.xlu1 %v1552_v48 }
 0x283   : > { %v1551_v61 = vpop.xlane.xlu0 %1550 }
 0x284   : > { %v1555_v46 = vsub.f32 %v1547_v27, %v1551_v61  ;;  %v3034_v27 = vld [vmem:[%s3583_s11 + $0x1a8] sm:$0xff] }
 0x285   : > { %v1693_v49 = vpack.c.bf16 %v3036_v26, %v3034_v27  ;;  %v3298_v27 = vld [vmem:[%s4617_s2 + $0x48] sm:$0xff]   ;;  %v1682_v26 = vpack.c.bf16 %v3015_v31, %v3013_v23 }
 0x286   : > { %v1557_v17 = vmul.f32 1.442695, %v1555_v46 }
 0x287   : > { %1715 = vmatprep.subr.bf16.mxu1 %v1693_v49  ;;  %v3300_v49 = vld [vmem:[%s4617_s2 + $0x58] sm:$0xff]  }
 0x288   : > { %3305 = vpow2.f32 %v1557_v17  ;;  %1716 = vmatpush1.bf16.msra.mxu1 %v1692_v4 }
 0x289   : > { %1717 = vmatprep.subr.bf16.mxu1 %v1691_v28 }
 0x28c   : > { %1718 = vmatpush1.bf16.msra.mxu1 %v1690_v58 }
 0x28d   : > { %1719 = vmatprep.subr.bf16.mxu1 %v1689_v45 }
 0x290   : > { %1720 = vmatpush1.bf16.msra.mxu1 %v1688_v1 }
 0x291   : > { %1721 = vmatprep.subr.bf16.mxu1 %v1687_v21 }
 0x295   : > { %v3306_v32 = vpop.eup %3305 }
 0x296   : > { %v4089_v54 = vmul.f32 %v3306_v32, %v4036_v43 }
 0x297   : > { %v1554_v5 = vpop.xlane.xlu1 %1553 }
 0x298   : > { %v1556_v53 = vsub.f32 %v1548_v63, %v1554_v5  ;;  %v1563_v19 = vsel %vm1542_vm10, %v4089_v54, 0.0  ;;  %v1684_v63 = vpack.c.bf16 %v3019_v40, %v3017_v42 }
 0x299   : > { %1564 = vadd.xlane.f32.xlu0 %v1563_v19 }
 0x29a   : > { %v1559_v36 = vmul.f32 1.442695, %v1556_v53 }
 0x29c   : > { %3307 = vpow2.f32 %v1559_v36  ;;  %v3289_v36 = vld [vmem:[%s4617_s2] sm:$0xff]  }
 0x2a9   : > { %v3308_v3 = vpop.eup %3307 }
 0x2aa   : > { %v4093_v6 = vmul.f32 %v3308_v3, %v485_v47  ;;  %v1686_v47 = vpack.c.bf16 %v3023_v13, %v3021_v2  ;;  %v3304_v2 = vld [vmem:[%s4617_s2 + $0x78] sm:$0xff]  }
 0x2ac   : > { %v1566_v43 = vsel %vm1542_vm10, %v4093_v6, 0.0  ;;  %1722 = vmatpush1.bf16.msra.mxu1 %v1686_v47 }
 0x2ad   : > { %1567 = vadd.xlane.f32.xlu1 %v1566_v43  ;;  %1723 = vmatprep.subr.bf16.mxu1 %v1685_v56  ;;  %v1924_v43 = vsel %vm764_vm0, %v3770_v50, 0 }
 0x2b0   : > { %1724 = vmatpush1.bf16.msra.mxu1 %v1684_v63 }
 0x2b1   : > { %1725 = vmatprep.subr.bf16.mxu1 %v1683_v22 }
 0x2b4   : > { %1726 = vmatpush1.bf16.msra.mxu1 %v1682_v26 }
 0x2b5   : > { %3218 = vmatprep.subr.msk.bf16.mxu1 %vm764_vm0, %v3770_v50  ;;  %v3009_v50 = vld [vmem:[%s4198_s20] ss:$0 sm:$0xff] }
 0x322   : > { %v1565_v48 = vpop.xlane.xlu0 %1564 }
 0x323   : > { %v1569_v61 = vmax.f32 %v1565_v48, 1e-20 }
 0x325   : > { %3309 = vrcp.f32 %v1569_v61 }
 0x332   : > { %v3310_v32 = vpop.eup %3309 }
 0x333   : > { %v1573_v53 = vmul.f32 %v3310_v32, %v4089_v54  ;;  %v3290_v54 = vld [vmem:[%s4617_s2 + $0x8] sm:$0xff]  }
 0x336   : > { %v1568_v46 = vpop.xlane.xlu1 %1567 }
 0x337   : > { %v1570_v17 = vmax.f32 %v1568_v46, 1e-20 }
 0x339   : > { %3311 = vrcp.f32 %v1570_v17 }
 0x346   : > { %v3312_v5 = vpop.eup %3311 }
 0x347   : > { %v1574_v19 = vmul.f32 %v3312_v5, %v4093_v6  ;;  %v3291_v6 = vld [vmem:[%s4617_s2 + $0x10] sm:$0xff]  }
 0x349   : > { %v1575_v3 = vpack.c.bf16 %v1574_v19, %v1573_v53 }
 0x34b   : > { %3171 = vmatmul.mubr.msk.bf16.vlgmr.msra.gmra.mxu0 %vm1542_vm10, %v1575_v3 }
 0x34c   : > { %3175 = vmatpush3.bf16.msra.mxu0 %v1924_v43  ;;  %3176 = vmatprep.mubr.msk.bf16.mxu0 %vm715_vm1, %v3289_v36 }
 0x353   : > { %3177 = vmatmul.mubr.msk.bf16.vlgmr.msra.gmra.mxu0 %vm715_vm1, %v3290_v54  ;;  %v4655_v54 = vsub.s32 1, %v3707_v10 }
 0x354   : > { %3180 = vmatprep.mubr.msk.bf16.mxu0 %vm715_vm1, %v3291_v6 }
 0x35b   : > { %3181 = vmatmul.mubr.msk.bf16.gmra.mxu0 %vm715_vm1, %v3292_v15 }
 0x35c   : > { %3184 = vmatprep.mubr.msk.bf16.mxu0 %vm715_vm1, %v3293_v7 }
 0x363   : > { %3185 = vmatmul.mubr.msk.bf16.gmra.mxu0 %vm715_vm1, %v3294_v9 }
 0x364   : > { %3188 = vmatprep.mubr.msk.bf16.mxu0 %vm715_vm1, %v3295_v8 }
 0x36b   : > { %3189 = vmatmul.mubr.msk.bf16.gmra.mxu0 %vm715_vm1, %v3296_v18 }
 0x36c   : > { %3192 = vmatprep.mubr.msk.bf16.mxu0 %vm715_vm1, %v3297_v60 }
 0x373   : > { %3193 = vmatmul.mubr.msk.bf16.gmra.mxu0 %vm715_vm1, %v3298_v27 }
 0x374   : > { %3196 = vmatprep.mubr.msk.bf16.mxu0 %vm715_vm1, %v3299_v24 }
 0x37b   : > { %3197 = vmatmul.mubr.msk.bf16.gmra.mxu0 %vm715_vm1, %v3300_v49 }
 0x37c   : > { %3200 = vmatprep.mubr.msk.bf16.mxu0 %vm715_vm1, %v3301_v25 }
 0x383   : > { %3201 = vmatmul.mubr.msk.bf16.gmra.mxu0 %vm715_vm1, %v3302_v39 }
 0x40b   : > { %v1621_v16 = vpop.f32.mrf.mxu0 }
 0x40c   : > { %v1622_v4 = vadd.f32 %v3009_v50, %v1621_v16 }
 0x40d   : > { %v3172_v28 = vpop.f32.mrf.mxu0 }
 0x40e   : > { %v1635_v35 = vmul.f32 %v3011_v30, %v1622_v4 }
 0x40f   : > { %v1624_v34 = vpop.f32.mrf.mxu0 }
 0x410   : > { %v1625_v41 = vadd.f32 %v3009_v50, %v1624_v34  ;;  %v1644_v45 = vadd.f32 %v3012_v59, %v1635_v35 }
 0x411   : > { %v3173_v58 = vpop.f32.mrf.mxu0 }
 0x412   : > { %v1636_v44 = vmul.f32 %v3011_v30, %v1625_v41  ;;  %v1646_v1 = vmax.f32 %v1644_v45, 0.0 }
 0x413   : > { %v4226_v13 = vpop.f32.mrf.mxu0 }
 0x414   : > { %v1645_v57 = vadd.f32 %v3012_v59, %v1636_v44 }
 0x415   : > { %v1960_v47 = vpop.f32.mrf.mxu0 }
 0x416   : > { %v1647_v62 = vmax.f32 %v1645_v57, 0.0 }
 0x417   : > { %v4228_v0 = vpop.f32.mrf.mxu0 }
 0x418   : > { %v1648_v21 = vpack.c.bf16 %v1647_v62, %v1646_v1 }
 0x419   : > { %v1963_v11 = vpop.f32.mrf.mxu0 }
 0x41a   : > { %1744 = vmatmul.mubr.bf16.vlgmr.msra.gmra.mxu1 %v1648_v21 }
 0x41b   : > { %3215 = vmatpush3.bf16.msra.mxu1 %v1924_v43  ;;  %3204 = vmatprep.mubr.msk.bf16.mxu1 %vm715_vm1, %v3303_v38  ;;  %v4230_v42 = vpop.f32.mrf.mxu0  ;;  %v3045_v43 = vld [vmem:[%s3743_s21 + $0x2] sm:$0x3]  ;;  %s3355_s21 = sshll.u32 %s3424_s17, 4  ;;  %s3356_s21 = int_to_ptr.vmem [resolvable:$false] %s3355_s21 }
 0x41c   : > { %3208 = vmatprep.subr.bf16.mxu1 %v4654_v51  ;;  %v1708_v6 = vrot.slane %v3045_v43, %v4655_v54  ;;  %v1704_v9 = vrot.slane %v3045_v43, %v3750_v33  ;;  %p3358_p7 = scmp.lt.s32.totalorder %s4567_s29, %s3356_s21 }
 0x41d   : > { %v4232_v56 = vpop.f32.mrf.mxu0 }
 0x41f   : > { %v4234_v40 = vpop.f32.mrf.mxu0 }
 0x421   : > { %v4236_v63 = vpop.f32.mrf.mxu0 }
 0x422   : > { %3205 = vmatmul.mubr.msk.bf16.vlgmr.msra.gmra.mxu1 %vm715_vm1, %v3304_v2 }
 0x423   : > { %3210 = vmatprep.mubr.msk.bf16.mxu1 %vm3423_vm11, %v4654_v51  ;;  %v4238_v48 = vpop.f32.mrf.mxu0 }
 0x425   : > { %v4240_v61 = vpop.f32.mrf.mxu0 }
 0x427   : > { %v4242_v51 = vpop.f32.mrf.mxu0 }
 0x429   : > { %v4244_v46 = vpop.f32.mrf.mxu0 }
 0x42b   : > { %v4246_v17 = vpop.f32.mrf.mxu0 }
 0x42d   : > { %v4248_v32 = vpop.f32.mrf.mxu0 }
 0x42f   : > { %v4250_v5 = vpop.f32.mrf.mxu0 }
 0x431   : > { %v4252_v53 = vpop.f32.mrf.mxu0 }
 0x433   : > { %v4254_v19 = vpop.f32.mrf.mxu0 }
 0x435   : > { %v4256_v36 = vpop.f32.mrf.mxu0 }
 0x437   : > { %v4258_v3 = vpop.f32.mrf.mxu0 }
 0x439   : > { %v4263_v7 = vpop.f32.mrf.mxu0 }
 0x43b   : > { %v4269_v22 = vpop.f32.mrf.mxu0 }
 0x43d   : > { %v2040_v24 = vpop.f32.mrf.mxu0 }
 0x43f   : > { %v3199_v35 = vpop.f32.mrf.mxu0 }
 0x441   : > { %v4289_v21 = vpop.f32.mrf.mxu0 }
 0x4da   : > { %v1745_v15 = vpop.f32.mrf.mxu1 }
 0x4db   : > { %v4271_v31 = vadd.f32 %v1745_v15, %v1704_v9 }
 0x4dc   : > { %v1747_v8 = vpop.f32.mrf.mxu1 }
 0x4dd   : > { %v1748_v18 = vadd.f32 %v1747_v8, %v1708_v6 }
 0x4de   : > { %v1749_v52 = vpop.f32.mrf.mxu1 }
 0x4df   : > { %v2096_v20 = vrot.slane %v1748_v18, %v3757_v37  ;;  %v4267_v23 = vadd.f32 %v1749_v52, %v1704_v9  ;;  %v2089_v49 = vcombine.high %v1748_v18, %v1748_v18 }
 0x4e0   : > { %v1751_v60 = vpop.f32.mrf.mxu1 }
 0x4e1   : > { %v1752_v27 = vadd.f32 %v1751_v60, %v1708_v6  ;;  %v2112_v10 = vrot.slane %v2096_v20, %v3757_v37  ;;  %v2722_v26 = vpack.c.bf16 %v4267_v23, %v4271_v31  ;;  %v2104_v4 = vcombine.high %v2096_v20, %v2096_v20  ;;  %v3202_v60 = vpop.f32.mrf.mxu0 }
 0x4e2   : > { %v2103_v59 = vrot.slane %v2089_v49, %v3757_v37 }
 0x4e3   : > { %v2138_v25 = vcombine.high %v1752_v27, %v1752_v27  ;;  %v2145_v39 = vrot.slane %v1752_v27, %v3757_v37  ;;  %3209 = vmatpush3.bf16.msra.mxu1 %v2722_v26  ;;  %v2190_v50 = vrot.slane %v2112_v10, %v3750_v33  ;;  %v4287_v62 = vrot.slane %v2104_v4, %v3757_v37  ;;  %v4314_v4 = vpop.f32.mrf.mxu0 }
 0x4e4   : > { %v2105_v2 = vcombine.high %v2103_v59, %v2103_v59  ;;  %v4292_v43 = vrot.slane %v2103_v59, %v3757_v37  ;;  %v2134_v18 = vcombine.high %v2112_v10, %v2112_v10  ;;  %v4316_v59 = vpop.f32.mrf.mxu1 }
 0x4e5   : > { %v2152_v16 = vrot.slane %v2138_v25, %v3757_v37  ;;  %v2153_v30 = vcombine.high %v2145_v39, %v2145_v39  ;;  %v2161_v28 = vrot.slane %v2145_v39, %v3757_v37  ;;  %v2267_v57 = vadd.f32 %v2190_v50, %v4271_v31 }
 0x4e6   : > { %v2268_v1 = vadd.f32 %v2190_v50, %v4267_v23  ;;  %v2194_v52 = vrot.slane %v4287_v62, %v3750_v33  ;;  %v4300_v26 = vrot.slane %v2105_v2, %v3757_v37  ;;  %v2072_v29 = vpop.f32.mrf.mxu1 }
 0x4e7   : > { %v2154_v34 = vcombine.high %v2152_v16, %v2152_v16  ;;  %v2175_v41 = vrot.slane %v2153_v30, %v3757_v37  ;;  %v2168_v58 = vrot.slane %v2152_v16, %v3757_v37  ;;  %v2183_v38 = vcombine.high %v2161_v28, %v2161_v28 }
 0x4e8   : > { %v2299_v9 = vadd.f32 %v2267_v57, %v1960_v47  ;;  %v2300_v8 = vadd.f32 %v2268_v1, %v1963_v11  ;;  %v2222_v57 = vrot.slane %v2161_v28, %v3750_v33 }
 0x4e9   : > { %v2185_v45 = vcombine.high %v2175_v41, %v2175_v41  ;;  %v2182_v44 = vrot.slane %v2154_v34, %v3757_v37  ;;  %v2184_v6 = vcombine.high %v2168_v58, %v2168_v58  ;;  %v2230_v20 = vrot.slane %v2183_v38, %v3750_v33  ;;  %v4327_v38 = vld [vmem:[%s3801_s28 + $0x1] ss:$0 sm:$0xff]  ;;  %s3357_s28 = scalar_lea.vmem %s3356_s21, 512 }
 0x4ea   : > { %v4306_v39 = vrot.slane %v2168_v58, %v3750_v33  ;;  %v2331_v50 = vmul.f32 0.2, %v2299_v9  ;;  %v2332_v16 = vmul.f32 0.2, %v2300_v8  ;;  %v2198_v37 = vrot.slane %v2134_v18, %v3750_v33  ;;  %p3359_p8 = scmp.lt.s32.totalorder %s3357_s28, %s3351_s12 }
 0x4eb   : > { %v2234_v54 = vrot.slane %v2185_v45, %v3750_v33  ;;  %v2242_v15 = vrot.slane %v2182_v44, %v3750_v33  ;;  %v2186_v27 = vcombine.high %v2182_v44, %v2182_v44  ;;  %v2246_v47 = vrot.slane %v2184_v6, %v3750_v33 }
 0x4ec   : > { %v2287_v30 = vadd.f32 %v2230_v20, %v4271_v31  ;;  %v2269_v58 = vadd.f32 %v2194_v52, %v4271_v31  ;;  %v2206_v44 = vrot.slane %v4292_v43, %v3750_v33  ;;  %v4330_v2 = vrot.slane %v2175_v41, %v3750_v33  ;;  %p3360_p10 = por %p3359_p8, %p3358_p7 }
 0x4ed   : > { %v2290_v25 = vadd.f32 %v2234_v54, %v4267_v23  ;;  %v2293_v10 = vadd.f32 %v2242_v15, %v4271_v31  ;;  %v2250_v34 = vrot.slane %v2186_v27, %v3750_v33  ;;  %v2294_v1 = vadd.f32 %v2242_v15, %v4267_v23 }
 0x4ee   : > { %v4336_v18 = vadd.f32 %v4306_v39, %v4271_v31  ;;  %v2295_v27 = vadd.f32 %v2246_v47, %v4271_v31  ;;  %v4340_v45 = vadd.f32 %v2230_v20, %v4267_v23  ;;  %v2363_v28 = vmax.f32 %v2299_v9, %v2331_v50  ;;  %p3361_p0 = pnand %p3360_p10, %p3354_p5 }
 0x4ef   : > { %v4332_v6 = vadd.f32 %v3199_v35, %v2290_v25  ;;  %v4342_v49 = vadd.f32 %v3202_v60, %v2293_v10  ;;  %v2364_v15 = vmax.f32 %v2300_v8, %v2332_v16  ;;  %v4344_v11 = vadd.f32 %v2287_v30, %v2040_v24  ;;  %v3203_v25 = vpop.f32.mrf.mxu0 }
 0x4f0   : > { %v4347_v41 = vadd.f32 %v2234_v54, %v4271_v31  ;;  %v2297_v35 = vadd.f32 %v2250_v34, %v4271_v31  ;;  %v2301_v55 = vadd.f32 %v4226_v13, %v2269_v58  ;;  %v4351_v14 = vadd.f32 %v3203_v25, %v2294_v1 }
 0x4f1   : > { %v2401_v20 = vmul.f32 %v4327_v38, %v2363_v28  ;;  %v2402_v60 = vmul.f32 %v4327_v38, %v2364_v15  ;;  %v2270_v9 = vadd.f32 %v2194_v52, %v4267_v23  ;;  %v4357_v24 = vmul.f32 0.2, %v4332_v6  ;;  %v3207_v52 = vpop.f32.mrf.mxu1 }
 0x4f2   : > { %v4359_v8 = vadd.f32 %v2295_v27, %v2072_v29  ;;  %v2333_v54 = vmul.f32 0.2, %v2301_v55  ;;  %v2271_v10 = vadd.f32 %v2198_v37, %v4271_v31  ;;  %v4363_v50 = vmul.f32 0.2, %v4342_v49 }
 0x4f3   : > { %2433 = vadd.xlane.f32.xlu0 %v2401_v20  ;;  %2435 = vadd.xlane.f32.xlu1 %v2402_v60  ;;  %v2302_v13 = vadd.f32 %v4228_v0, %v2270_v9  ;;  %v2272_v16 = vadd.f32 %v2198_v37, %v4267_v23  ;;  %v2275_v30 = vadd.f32 %v2206_v44, %v4271_v31 }
 0x4f4   : > { %v2298_v58 = vadd.f32 %v2250_v34, %v4267_v23  ;;  %v2296_v29 = vadd.f32 %v2246_v47, %v4267_v23  ;;  %v2365_v1 = vmax.f32 %v2301_v55, %v2333_v54  ;;  %v2303_v27 = vadd.f32 %v2271_v10, %v4232_v56  ;;  %v2075_v56 = vpop.f32.mrf.mxu1 }
 0x4f5   : > { %v2334_v28 = vmul.f32 0.2, %v2302_v13  ;;  %v2304_v15 = vadd.f32 %v2272_v16, %v4236_v63  ;;  %v2307_v25 = vadd.f32 %v2275_v30, %v4240_v61  ;;  %v2276_v20 = vadd.f32 %v2206_v44, %v4267_v23 }
 0x4f6   : > { %v2403_v0 = vmul.f32 %v4327_v38, %v2365_v1  ;;  %v2335_v37 = vmul.f32 0.2, %v2303_v27  ;;  %v2283_v60 = vadd.f32 %v2222_v57, %v4271_v31  ;;  %v2284_v9 = vadd.f32 %v2222_v57, %v4267_v23 }
 0x4f7   : > { %v2366_v34 = vmax.f32 %v2302_v13, %v2334_v28  ;;  %v2336_v12 = vmul.f32 0.2, %v2304_v15  ;;  %v2339_v47 = vmul.f32 0.2, %v2307_v25  ;;  %v2308_v55 = vadd.f32 %v2276_v20, %v4244_v46 }
 0x4f8   : > { %2437 = vadd.xlane.f32.xlu0 %v2403_v0  ;;  %v2367_v54 = vmax.f32 %v2303_v27, %v2335_v37  ;;  %v2315_v63 = vadd.f32 %v2283_v60, %v4256_v36  ;;  %v2316_v61 = vadd.f32 %v2284_v9, %v4263_v7  ;;  %v4656_v44 = vcombine.high %v4287_v62, %v4287_v62 }
 0x4f9   : > { %v2404_v16 = vmul.f32 %v4327_v38, %v2366_v34  ;;  %v2368_v57 = vmax.f32 %v2304_v15, %v2336_v12  ;;  %v2371_v13 = vmax.f32 %v2307_v25, %v2339_v47  ;;  %v2340_v30 = vmul.f32 0.2, %v2308_v55 }
 0x4fa   : > { %v2202_v10 = vrot.slane %v4656_v44, %v3750_v33  ;;  %v4386_v1 = vadd.f32 %v4316_v59, %v2297_v35  ;;  %v2405_v46 = vmul.f32 %v4327_v38, %v2367_v54  ;;  %v2347_v27 = vmul.f32 0.2, %v2315_v63 }
 0x4fb   : > { %v4391_v7 = vmul.f32 0.2, %v4351_v14  ;;  %v4393_v28 = vadd.f32 %v3207_v52, %v2298_v58  ;;  %v4395_v62 = vadd.f32 %v2296_v29, %v2075_v56  ;;  %2439 = vadd.xlane.f32.xlu1 %v2404_v16  ;;  %v2406_v15 = vmul.f32 %v4327_v38, %v2368_v57 }
 0x4fc   : > { %v2273_v36 = vadd.f32 %v2202_v10, %v4271_v31  ;;  %v2274_v12 = vadd.f32 %v2202_v10, %v4267_v23  ;;  %2441 = vadd.xlane.f32.xlu0 %v2405_v46  ;;  %v2348_v59 = vmul.f32 0.2, %v2316_v61  ;;  %v2210_v25 = vrot.slane %v4300_v26, %v3750_v33 }
 0x4fd   : > { %v2409_v20 = vmul.f32 %v4327_v38, %v2371_v13  ;;  %v2372_v0 = vmax.f32 %v2308_v55, %v2340_v30  ;;  %v4657_v58 = vcombine.high %v4292_v43, %v4292_v43  ;;  %v2379_v37 = vmax.f32 %v2315_v63, %v2347_v27 }
 0x4fe   : > { %v2305_v35 = vadd.f32 %v4230_v42, %v2273_v36  ;;  %v2306_v52 = vadd.f32 %v4234_v40, %v2274_v12  ;;  %v2277_v9 = vadd.f32 %v2210_v25, %v4271_v31  ;;  %v2285_v42 = vadd.f32 %v4330_v2, %v4271_v31 }
 0x4ff   : > { %v2214_v29 = vrot.slane %v4657_v58, %v3750_v33  ;;  %2443 = vadd.xlane.f32.xlu1 %v2406_v15  ;;  %v2278_v47 = vadd.f32 %v2210_v25, %v4267_v23  ;;  %v2361_v56 = vmul.f32 0.2, %v4386_v1  ;;  %v2359_v43 = vmul.f32 0.2, %v4359_v8 }
 0x500   : > { %v2337_v60 = vmul.f32 0.2, %v2305_v35  ;;  %v2338_v34 = vmul.f32 0.2, %v2306_v52  ;;  %v2360_v54 = vmul.f32 0.2, %v4395_v62  ;;  %2449 = vadd.xlane.f32.xlu0 %v2409_v20  ;;  %v2309_v63 = vadd.f32 %v4238_v48, %v2277_v9 }
 0x501   : > { %v2279_v55 = vadd.f32 %v2214_v29, %v4271_v31  ;;  %v2280_v40 = vadd.f32 %v2214_v29, %v4267_v23  ;;  %v2410_v44 = vmul.f32 %v4327_v38, %v2372_v0  ;;  %v2380_v10 = vmax.f32 %v2316_v61, %v2348_v59 }
 0x502   : > { %v2310_v16 = vadd.f32 %v4242_v51, %v2278_v47  ;;  %v2362_v13 = vmul.f32 0.2, %v4393_v28  ;;  %v2417_v30 = vmul.f32 %v4327_v38, %v2379_v37  ;;  %v2369_v46 = vmax.f32 %v2305_v35, %v2337_v60 }
 0x503   : > { %v2311_v57 = vadd.f32 %v2279_v55, %v4248_v32  ;;  %v2341_v27 = vmul.f32 0.2, %v2309_v63  ;;  %2451 = vadd.xlane.f32.xlu1 %v2410_v44  ;;  %v2370_v36 = vmax.f32 %v2306_v52, %v2338_v34  ;;  %v2312_v12 = vadd.f32 %v2280_v40, %v4252_v53 }
 0x504   : > { %v2317_v15 = vadd.f32 %v4254_v19, %v2285_v42  ;;  %v2286_v48 = vadd.f32 %v4330_v2, %v4267_v23  ;;  %v2386_v51 = vmax.f32 %v4332_v6, %v4357_v24  ;;  %v2389_v32 = vmax.f32 %v4342_v49, %v4363_v50  ;;  %2465 = vadd.xlane.f32.xlu0 %v2417_v30 }
 0x505   : > { %v2342_v61 = vmul.f32 0.2, %v2310_v16  ;;  %v2343_v59 = vmul.f32 0.2, %v2311_v57  ;;  %v2390_v35 = vmax.f32 %v4351_v14, %v4391_v7  ;;  %v2391_v25 = vmax.f32 %v4359_v8, %v2359_v43  ;;  %v2059_v43 = vpop.f32.mrf.mxu0 }
 0x506   : > { %v2392_v53 = vmax.f32 %v4395_v62, %v2360_v54  ;;  %v2418_v19 = vmul.f32 %v4327_v38, %v2380_v10  ;;  %v2393_v2 = vmax.f32 %v4386_v1, %v2361_v56  ;;  %v2394_v20 = vmax.f32 %v4393_v28, %v2362_v13 }
 0x507   : > { %v2407_v6 = vmul.f32 %v4327_v38, %v2369_v46  ;;  %v2373_v24 = vmax.f32 %v2309_v63, %v2341_v27  ;;  %v2408_v49 = vmul.f32 %v4327_v38, %v2370_v36  ;;  %v2344_v50 = vmul.f32 0.2, %v2312_v12 }
 0x508   : > { %2467 = vadd.xlane.f32.xlu1 %v2418_v19  ;;  %v2349_v0 = vmul.f32 0.2, %v2317_v15  ;;  %v2318_v14 = vadd.f32 %v4258_v3, %v2286_v48  ;;  %v2374_v8 = vmax.f32 %v2310_v16, %v2342_v61  ;;  %v2375_v7 = vmax.f32 %v2311_v57, %v2343_v59 }
 0x509   : > { %2445 = vadd.xlane.f32.xlu0 %v2407_v6  ;;  %v2321_v62 = vadd.f32 %v4269_v22, %v4347_v41  ;;  %v2424_v1 = vmul.f32 %v4327_v38, %v2386_v51  ;;  %v2427_v28 = vmul.f32 %v4327_v38, %v2389_v32  ;;  %v2428_v52 = vmul.f32 %v4327_v38, %v2390_v35 }
 0x50a   : > { %v2429_v58 = vmul.f32 %v4327_v38, %v2391_v25  ;;  %v2430_v29 = vmul.f32 %v4327_v38, %v2392_v53  ;;  %v2411_v37 = vmul.f32 %v4327_v38, %v2373_v24  ;;  %v4658_v3 = vcombine.high %v4300_v26, %v4300_v26 }
 0x50b   : > { %v2353_v9 = vmul.f32 0.2, %v2321_v62  ;;  %v2431_v22 = vmul.f32 %v4327_v38, %v2393_v2  ;;  %v2432_v41 = vmul.f32 %v4327_v38, %v2394_v20  ;;  %v2320_v42 = vadd.f32 %v4340_v45, %v4289_v21 }
 0x50c   : > { %v2218_v60 = vrot.slane %v4658_v3, %v3750_v33  ;;  %2447 = vadd.xlane.f32.xlu1 %v2408_v49  ;;  %v2323_v34 = vadd.f32 %v4336_v18, %v4314_v4  ;;  %v2292_v47 = vadd.f32 %v4306_v39, %v4267_v23  ;;  %v2351_v26 = vmul.f32 0.2, %v4344_v11 }
 0x50d   : > { %2453 = vadd.xlane.f32.xlu0 %v2411_v37  ;;  %v2385_v55 = vmax.f32 %v2321_v62, %v2353_v9  ;;  %v2412_v33 = vmul.f32 %v4327_v38, %v2374_v8  ;;  %v2376_v40 = vmax.f32 %v2312_v12, %v2344_v50  ;;  %v2350_v56 = vmul.f32 0.2, %v2318_v14 }
 0x50e   : > { %v2413_v54 = vmul.f32 %v4327_v38, %v2375_v7  ;;  %v2381_v63 = vmax.f32 %v2317_v15, %v2349_v0  ;;  %v2281_v21 = vadd.f32 %v2218_v60, %v4271_v31  ;;  %v2352_v4 = vmul.f32 0.2, %v2320_v42 }
 0x50f   : > { %v2423_v45 = vmul.f32 %v4327_v38, %v2385_v55  ;;  %v2324_v39 = vadd.f32 %v2292_v47, %v2059_v43  ;;  %v2414_v18 = vmul.f32 %v4327_v38, %v2376_v40  ;;  %v2382_v44 = vmax.f32 %v2318_v14, %v2350_v56 }
 0x510   : > { %2455 = vadd.xlane.f32.xlu1 %v2412_v33  ;;  %v2282_v10 = vadd.f32 %v2218_v60, %v4267_v23  ;;  %v2383_v16 = vmax.f32 %v4344_v11, %v2351_v26  ;;  %v2355_v57 = vmul.f32 0.2, %v2323_v34  ;;  %v2419_v13 = vmul.f32 %v4327_v38, %v2381_v63 }
 0x511   : > { %2457 = vadd.xlane.f32.xlu0 %v2413_v54  ;;  %v2313_v30 = vadd.f32 %v4246_v17, %v2281_v21  ;;  %v2384_v31 = vmax.f32 %v2320_v42, %v2352_v4  ;;  %v2356_v46 = vmul.f32 0.2, %v2324_v39  ;;  %v2420_v27 = vmul.f32 %v4327_v38, %v2382_v44 }
 0x512   : > { %v2314_v36 = vadd.f32 %v4250_v5, %v2282_v10  ;;  %v2387_v12 = vmax.f32 %v2323_v34, %v2355_v57  ;;  %v2421_v15 = vmul.f32 %v4327_v38, %v2383_v16 }
 0x513   : > { %v2345_v48 = vmul.f32 0.2, %v2313_v30  ;;  %v2388_v23 = vmax.f32 %v2324_v39, %v2356_v46  ;;  %v2422_v11 = vmul.f32 %v4327_v38, %v2384_v31 }
 0x514   : > { %2459 = vadd.xlane.f32.xlu1 %v2414_v18  ;;  %v2346_v51 = vmul.f32 0.2, %v2314_v36  ;;  %v2425_v17 = vmul.f32 %v4327_v38, %v2387_v12 }
 0x515   : > { %2469 = vadd.xlane.f32.xlu0 %v2419_v13  ;;  %v2377_v32 = vmax.f32 %v2313_v30, %v2345_v48  ;;  %v2426_v61 = vmul.f32 %v4327_v38, %v2388_v23 }
 0x516   : > { %v2378_v59 = vmax.f32 %v2314_v36, %v2346_v51 }
 0x517   : > { %v2415_v5 = vmul.f32 %v4327_v38, %v2377_v32 }
 0x518   : > { %2471 = vadd.xlane.f32.xlu1 %v2420_v27  ;;  %v2416_v35 = vmul.f32 %v4327_v38, %v2378_v59 }
 0x519   : > { %2473 = vadd.xlane.f32.xlu0 %v2421_v15 }
 0x51c   : > { %2475 = vadd.xlane.f32.xlu1 %v2422_v11 }
 0x51d   : > { %2481 = vadd.xlane.f32.xlu0 %v2425_v17 }
 0x520   : > { %2483 = vadd.xlane.f32.xlu1 %v2426_v61 }
 0x521   : > { %2461 = vadd.xlane.f32.xlu0 %v2415_v5 }
 0x524   : > { %2463 = vadd.xlane.f32.xlu1 %v2416_v35 }
 0x525   : > { %2477 = vadd.xlane.f32.xlu0 %v2423_v45 }
 0x528   : > { %2479 = vadd.xlane.f32.xlu1 %v2424_v1 }
 0x529   : > { %2485 = vadd.xlane.f32.xlu0 %v2427_v28 }
 0x52c   : > { %2487 = vadd.xlane.f32.xlu1 %v2428_v52  ;;  %v4659_v52 = vld [vmem:[#allocation13_spill] sm:$0xff] }
 0x52d   : > { %2489 = vadd.xlane.f32.xlu0 %v2429_v58 }
 0x530   : > { %2491 = vadd.xlane.f32.xlu1 %v2430_v29  ;;  %v4660_v29 = vld [vmem:[#allocation14_spill] sm:$0xff] }
 0x531   : > { %2493 = vadd.xlane.f32.xlu0 %v2431_v22 }
 0x534   : > { %2495 = vadd.xlane.f32.xlu1 %v2432_v41 }
 0x57c   : > { %v2434_v25 = vpop.xlane.xlu0 %2433  ;;  %v2436_v53 = vpop.xlane.xlu1 %2435 }
 0x57d   : > { %v2532_v9 = vrot.slane %v2434_v25, %v4659_v52  ;;  %v2536_v22 = vrot.slane %v2436_v53, %v4660_v29 }
 0x57f   : > { %v2537_v40 = vsel %vm1382_vm2, %v2536_v22, %v2532_v9  ;;  %v4661_v9 = vld [vmem:[#allocation15_spill] sm:$0xff] }
 0x581   : > { %v2438_v19 = vpop.xlane.xlu0 %2437 }
 0x582   : > { %v2541_v58 = vrot.slane %v2438_v19, %v4659_v52 }
 0x584   : > { %v2440_v2 = vpop.xlane.xlu1 %2439 }
 0x585   : > { %v2442_v20 = vpop.xlane.xlu0 %2441  ;;  %v2545_v37 = vrot.slane %v2440_v2, %v4660_v29 }
 0x586   : > { %v2550_v41 = vrot.slane %v2442_v20, %v4659_v52 }
 0x587   : > { %v2546_v55 = vsel %vm1382_vm2, %v2545_v37, %v2541_v58 }
 0x588   : > { %v2444_v6 = vpop.xlane.xlu1 %2443  ;;  %v2673_v43 = vsel %vm1519_vm3, %v2546_v55, %v2537_v40 }
 0x589   : > { %v2450_v24 = vpop.xlane.xlu0 %2449  ;;  %v2554_v42 = vrot.slane %v2444_v6, %v4660_v29 }
 0x58a   : > { %v2568_v45 = vrot.slane %v2450_v24, %v4659_v52 }
 0x58b   : > { %v2555_v56 = vsel %vm1382_vm2, %v2554_v42, %v2550_v41 }
 0x58c   : > { %v2452_v49 = vpop.xlane.xlu1 %2451  ;;  %v2674_v10 = vsel %vm1521_vm4, %v2555_v56, %v2673_v43 }
 0x58d   : > { %v4479_v50 = vpop.xlane.xlu0 %2465  ;;  %v2572_v4 = vrot.slane %v2452_v49, %v4660_v29 }
 0x58e   : > { %v2604_v25 = vrot.slane %v4479_v50, %v4659_v52 }
 0x58f   : > { %v2573_v31 = vsel %vm1382_vm2, %v2572_v4, %v2568_v45  ;;  %v4662_v45 = vld [vmem:[#allocation16_spill] sm:$0xff] }
 0x591   : > { %v4481_v38 = vpop.xlane.xlu1 %2467 }
 0x592   : > { %v2446_v0 = vpop.xlane.xlu0 %2445  ;;  %v2608_v53 = vrot.slane %v4481_v38, %v4660_v29 }
 0x593   : > { %v2559_v34 = vrot.slane %v2446_v0, %v4659_v52 }
 0x594   : > { %v2609_v0 = vsel %vm1382_vm2, %v2608_v53, %v2604_v25  ;;  %v3085_v53 = vld [vmem:[%s4204_s18 + $0x1] ss:$0 sm:$0xff] }
 0x595   : > { %v2448_v14 = vpop.xlane.xlu1 %2447 }
 0x596   : > { %v2454_v8 = vpop.xlane.xlu0 %2453  ;;  %v2563_v47 = vrot.slane %v2448_v14, %v4660_v29 }
 0x597   : > { %v2577_v63 = vrot.slane %v2454_v8, %v4659_v52 }
 0x598   : > { %v2564_v54 = vsel %vm1382_vm2, %v2563_v47, %v2559_v34 }
 0x599   : > { %v2456_v7 = vpop.xlane.xlu1 %2455  ;;  %v2675_v57 = vsel %vm1523_vm5, %v2564_v54, %v2674_v10 }
 0x59a   : > { %v2458_v62 = vpop.xlane.xlu0 %2457  ;;  %v2581_v21 = vrot.slane %v2456_v7, %v4660_v29  ;;  %v2676_v36 = vsel %vm1525_vm6, %v2573_v31, %v2675_v57 }
 0x59b   : > { %v2586_v39 = vrot.slane %v2458_v62, %v4659_v52 }
 0x59c   : > { %v2582_v13 = vsel %vm1382_vm2, %v2581_v21, %v2577_v63 }
 0x59d   : > { %v2460_v1 = vpop.xlane.xlu1 %2459  ;;  %v2677_v48 = vsel %vm1527_vm7, %v2582_v13, %v2676_v36  ;;  %v3322_v36 = vld [vmem:[%s4616_s1 + $0x8] sm:$0xff] }
 0x59e   : > { %v2470_v28 = vpop.xlane.xlu0 %2469  ;;  %v2590_v18 = vrot.slane %v2460_v1, %v4660_v29 }
 0x59f   : > { %v2613_v32 = vrot.slane %v2470_v28, %v4659_v52 }
 0x5a0   : > { %v2591_v46 = vsel %vm1382_vm2, %v2590_v18, %v2586_v39 }
 0x5a1   : > { %v2472_v3 = vpop.xlane.xlu1 %2471  ;;  %v2678_v23 = vsel %vm1529_vm8, %v2591_v46, %v2677_v48 }
 0x5a2   : > { %v2474_v60 = vpop.xlane.xlu0 %2473  ;;  %v2617_v61 = vrot.slane %v2472_v3, %v4660_v29 }
 0x5a3   : > { %v2622_v5 = vrot.slane %v2474_v60, %v4659_v52 }
 0x5a4   : > { %v2618_v6 = vsel %vm1382_vm2, %v2617_v61, %v2613_v32 }
 0x5a5   : > { %v2476_v26 = vpop.xlane.xlu1 %2475  ;;  %v2680_v38 = vsel %vm1519_vm3, %v2618_v6, %v2609_v0 }
 0x5a6   : > { %v2482_v33 = vpop.xlane.xlu0 %2481  ;;  %v2626_v35 = vrot.slane %v2476_v26, %v4660_v29 }
 0x5a7   : > { %v2640_v7 = vrot.slane %v2482_v33, %v4659_v52 }
 0x5a8   : > { %v2627_v49 = vsel %vm1382_vm2, %v2626_v35, %v2622_v5  ;;  %v3082_v35 = vld [vmem:[%s4198_s20 + $0x1] ss:$0 sm:$0xff] }
 0x5a9   : > { %v2484_v44 = vpop.xlane.xlu1 %2483  ;;  %v2681_v37 = vsel %vm1521_vm4, %v2627_v49, %v2680_v38 }
 0x5aa   : > { %v2462_v16 = vpop.xlane.xlu0 %2461  ;;  %v2644_v62 = vrot.slane %v2484_v44, %v4660_v29 }
 0x5ab   : > { %v2595_v30 = vrot.slane %v2462_v16, %v4659_v52 }
 0x5ac   : > { %v2645_v55 = vsel %vm1382_vm2, %v2644_v62, %v2640_v7 }
 0x5ad   : > { %v2464_v27 = vpop.xlane.xlu1 %2463 }
 0x5ae   : > { %v2599_v12 = vrot.slane %v2464_v27, %v4660_v29  ;;  %v2478_v15 = vpop.xlane.xlu0 %2477 }
 0x5af   : > { %v2631_v19 = vrot.slane %v2478_v15, %v4659_v52 }
 0x5b0   : > { %v2600_v11 = vsel %vm1382_vm2, %v2599_v12, %v2595_v30  ;;  %v3321_v30 = vld [vmem:[%s4616_s1] sm:$0xff] }
 0x5b1   : > { %v2679_v51 = vsel %vm1531_vm9, %v2600_v11, %v2678_v23  ;;  %v2480_v17 = vpop.xlane.xlu1 %2479 }
 0x5b2   : > { %2689 = vst.msk [vmem:[#allocation2] sm:$0xff] %vm1542_vm10, %v2679_v51  ;;  %v2486_v59 = vpop.xlane.xlu0 %2485  ;;  %v2635_v2 = vrot.slane %v2480_v17, %v4660_v29 }
 0x5b3   : > { %v2649_v8 = vrot.slane %v2486_v59, %v4659_v52 }
 0x5b4   : > { %v2636_v14 = vsel %vm1382_vm2, %v2635_v2, %v2631_v19  ;;  %v3087_v2 = vld [vmem:[%s4212_s30 + $0x1] ss:$0 sm:$0xff]  ;;  %s4572_s30 = scalar_lea.hbm %s4625_s10, %s3095_s23 }
 0x5b5   : > { %v2488_v20 = vpop.xlane.xlu1 %2487  ;;  %v2682_v41 = vsel %vm1523_vm5, %v2636_v14, %v2681_v37 }
 0x5b6   : > { %v2490_v24 = vpop.xlane.xlu0 %2489  ;;  %v2653_v50 = vrot.slane %v2488_v20, %v4660_v29  ;;  %v2683_v40 = vsel %vm1525_vm6, %v2645_v55, %v2682_v41 }
 0x5b7   : > { %v2658_v1 = vrot.slane %v2490_v24, %v4659_v52 }
 0x5b8   : > { %v2654_v42 = vsel %vm1382_vm2, %v2653_v50, %v2649_v8 }
 0x5b9   : > { %v2492_v28 = vpop.xlane.xlu1 %2491  ;;  %v2691_v58 = vld [vmem:[#allocation2] sm:$0xff]  ;;  %v2684_v43 = vsel %vm1527_vm7, %v2654_v42, %v2683_v40 }
 0x5ba   : > { %v2662_v3 = vrot.slane %v2492_v28, %v4660_v29  ;;  %v2494_v60 = vpop.xlane.xlu0 %2493  ;;  %v2693_v22 = vadd.f32 %v2691_v58, %v4661_v9 }
 0x5bb   : > { %v2667_v34 = vrot.slane %v2494_v60, %v4659_v52 }
 0x5bc   : > { %v2695_v47 = vsel %vm1542_vm10, %v2693_v22, -inf  ;;  %v2663_v26 = vsel %vm1382_vm2, %v2662_v3, %v2658_v1 }
 0x5bd   : > { %2696 = vmax.xlane.f32.xlu0 %v2695_v47  ;;  %v2496_v33 = vpop.xlane.xlu1 %2495  ;;  %v2685_v54 = vsel %vm1529_vm8, %v2663_v26, %v2684_v43 }
 0x5be   : > { %v2671_v56 = vrot.slane %v2496_v33, %v4660_v29 }
 0x5c0   : > { %v2672_v63 = vsel %vm1382_vm2, %v2671_v56, %v2667_v34 }
 0x5c1   : > { %v2686_v52 = vsel %vm1531_vm9, %v2672_v63, %v2685_v54 }
 0x5c2   : > { %2690 = vst.msk [vmem:[#allocation2 + $0x8] sm:$0xff] %vm1542_vm10, %v2686_v52 }
 0x5c9   : > { %v2692_v21 = vld [vmem:[#allocation2 + $0x8] sm:$0xff] }
 0x5ca   : > { %v2694_v4 = vadd.f32 %v2692_v21, %v4662_v45 }
 0x5cc   : > { %v2698_v39 = vsel %vm1542_vm10, %v2694_v4, -inf }
 0x5cd   : > { %2699 = vmax.xlane.f32.xlu1 %v2698_v39 }
 0x646   : > { %v2697_v18 = vpop.xlane.xlu0 %2696 }
 0x647   : > { %v2701_v44 = vsub.f32 %v2693_v22, %v2697_v18 }
 0x649   : > { %v2703_v10 = vmul.f32 1.442695, %v2701_v44 }
 0x64b   : > { %3313 = vpow2.f32 %v2703_v10 }
 0x656   : > { %v2700_v29 = vpop.xlane.xlu1 %2699 }
 0x657   : > { %v2702_v16 = vsub.f32 %v2694_v4, %v2700_v29 }
 0x658   : > { %v3314_v57 = vpop.eup %3313 }
 0x659   : > { %v2705_v13 = vmul.f32 1.442695, %v2702_v16  ;;  %v2707_v31 = vmul.f32 %v3321_v30, %v3314_v57 }
 0x65b   : > { %3315 = vpow2.f32 %v2705_v13  ;;  %v2709_v46 = vsel %vm1542_vm10, %v2707_v31, 0.0 }
 0x65c   : > { %2710 = vadd.xlane.f32.xlu0 %v2709_v46 }
 0x668   : > { %v3316_v27 = vpop.eup %3315 }
 0x669   : > { %v2708_v12 = vmul.f32 %v3322_v36, %v3316_v27 }
 0x66b   : > { %v2712_v15 = vsel %vm1542_vm10, %v2708_v12, 0.0 }
 0x66c   : > { %2713 = vadd.xlane.f32.xlu1 %v2712_v15 }
 0x6e5   : > { %v2711_v48 = vpop.xlane.xlu0 %2710 }
 0x6e6   : > { %v2715_v23 = vmax.f32 %v2711_v48, 1e-20 }
 0x6e8   : > { %3317 = vrcp.f32 %v2715_v23 }
 0x6f5   : > { %v2714_v11 = vpop.xlane.xlu1 %2713  ;;  %v3318_v17 = vpop.eup %3317 }
 0x6f6   : > { %v2716_v51 = vmax.f32 %v2714_v11, 1e-20  ;;  %v2719_v61 = vmul.f32 %v3318_v17, %v2707_v31 }
 0x6f8   : > { %3319 = vrcp.f32 %v2716_v51 }
 0x705   : > { %v3320_v32 = vpop.eup %3319 }
 0x706   : > { %v2720_v59 = vmul.f32 %v3320_v32, %v2708_v12 }
 0x708   : > { %v2721_v5 = vpack.c.bf16 %v2720_v59, %v2719_v61 }
 0x70a   : > { %3211 = vmatmul.mubr.msk.bf16.vlgmr.msra.gmra.mxu1 %vm1542_vm10, %v2721_v5 }
 0x7ca   : > { %v2768_v25 = vpop.f32.mrf.mxu1 }
 0x7cb   : > { %v2769_v19 = vadd.f32 %v3082_v35, %v2768_v25 }
 0x7cc   : > { %v3212_v20 = vpop.f32.mrf.mxu1 }
 0x7cd   : > { %v2783_v6 = vmul.f32 %v3085_v53, %v2769_v19 }
 0x7ce   : > { %v2771_v24 = vpop.f32.mrf.mxu1 }
 0x7cf   : > { %v2793_v49 = vadd.f32 %v3087_v2, %v2783_v6  ;;  %v2772_v0 = vadd.f32 %v3082_v35, %v2771_v24 }
 0x7d0   : > { %v3213_v14 = vpop.f32.mrf.mxu1 }
 0x7d1   : > { %v2795_v8 = vmax.f32 %v2793_v49, 0.0  ;;  %v2784_v50 = vmul.f32 %v3085_v53, %v2772_v0 }
 0x7d3   : > { %2797 = vst [vmem:[%s457_s15] sm:$0xff] %v2795_v8  ;;  %v2794_v38 = vadd.f32 %v3087_v2, %v2784_v50 }
 0x7d5   : > { %v2796_v7 = vmax.f32 %v2794_v38, 0.0 }
 0x7d7   : > { %2798 = vst [vmem:[%s457_s15 + $0x8] sm:$0xff] %v2796_v7 }
 0x7d8   : > { %3364 = shalt.err (!%p3361_p0)
}
 0x7d9   : > { %s3365_s27 = scalar_lea.hbm %s4572_s30, 256  ;;  %s3369_s15 = scalar_lea.hbm %s4625_s10, 512 }
 0x7da   : > { %p3366_p2 = scmp.ne.s32.totalorder %s4572_s30, %s3365_s27  ;;  %p3370_p3 = scmp.lt.s32.totalorder %s4572_s30, %s4625_s10 }
 0x7db   : > { %p3371_p6 = scmp.lt.s32.totalorder %s3369_s15, %s3365_s27 }
 0x7dc   : > { %p3367_p9 = pnand %p3366_p2, %p4663_p13 }
 0x7dd   : > { %p3372_p11 = por %p3371_p6, %p3370_p3 }
 0x7de   : > { %p3368_p1 = pneg %p3367_p9 }
 0x7e0   : > { %p3373_p12 = pnand %p3372_p11, %p3368_p1 }
 0x7e2   : > { %3376 = shalt.err (!%p3373_p12)
}
 0x7e3   : > { %s3425_s18 = smov 128   ;;  %s3426_s12 = smov 8  }
 0x7e4   : > { %3221 = dma.vmem_to_hbm [thread:$0]  (%p4663_p13), %s4567_s29, 256, %s4572_s30, %s2800_s24, %s3425_s18, %s3425_s18, %s3426_s12  }
 0x7e5 PF: > { %s2828_s17 = sand.u32 1, %s3403_s13   ;;  %p4664_p4 = scmp.ne.s32.totalorder %s4646_s26, 0 }
 0x7e6   : > { %p4665_p5 = scmp.ge.s32.totalorder %s3415_s16, 2  ;;  %s2829_s21 = scalar_lea.sflag [#allocation6], %s2828_s17 }
 0x7e8   : > { %p3228_p7 = pnand %p4665_p5, %p4664_p4 }
 0x7ea   : > { %p3229_p8 = pneg %p3228_p7 }
 0x7ec   : > { %3398 = dma.done.wait (%p3229_p8), %s2829_s21, 256  }
 0x7ed   : > { %3400 = vsyncadd (%p3229_p8), %s2829_s21, 4294967040  ;;  %s4666_s16 = sld [smem:[#allocation11_spill]]  ;;  %s4669_s13 = smov %s3407_s14 }
 0x7ee   : > { %s4667_s28 = sld [smem:[#allocation10_spill]] }
 0x7ef   : > { %s4668_s15 = sld [smem:[#allocation12_spill]] }
 0x7f3   : > { %p23_p10 = scmp.ge.s32.totalorder %s4666_s16, 4  }
 0x7f4   : > { %s4670_s14 = smov %s4667_s28 }
 0x7f5   :  { %25 = sbr.rel (!%p23_p10) target bundleno = 5 (0x5), region = 130 }
 0x7fa   :  { %2834 = vsyncpa [#allocation5], 1 }
 0x7fb   :  { %2836 = vsyncpa [#allocation5 + $0x1], 1 }
 0x7fc   :  { %2837 = vsyncpa [#allocation6], 1 }
 0x7fd   :  { %2839 = vsyncpa [#allocation6 + $0x1], 1 }

</bundles_post_ra>
